<compile_context>
chip_gen: v5e
topology: v5e:2x2
jax: 0.10.0
libtpu: 0.0.40
codegen_flags: <defaults>
</compile_context>

<pallas_src>
import jax
import jax.numpy as jnp
import numpy as np
from jax import lax
from jax.experimental import pallas as pl
from jax.experimental.pallas import tpu as pltpu

LOSS_LANES = 128  # lane-dense loss slab: lane 0 = rec, lane 1 = kl


def scpram_kernel(nr_ref,
                  x_ref, noise_ref, eps_ref,
                  w1_ref, b1_ref, w2_ref, b2_ref, w3_ref, b3_ref,
                  d1_ref, c1_ref, d2_ref, c2_ref, d3_ref, c3_ref,
                  xhat_ref, loss_ref):
    f32 = jnp.float32
    bf16 = jnp.bfloat16
    latent = eps_ref.shape[1]

    noise_rate = nr_ref[0]

    x = x_ref[...]
    x_noisy = x + noise_ref[...] * noise_rate

    # ---- encoder (bf16 MXU matmuls, f32 accumulation) ----
    h = jnp.dot(x_noisy.astype(bf16), w1_ref[...],
                preferred_element_type=f32) + b1_ref[...]
    h = jnp.maximum(h, 0.0)
    h = jnp.dot(h.astype(bf16), w2_ref[...],
                preferred_element_type=f32) + b2_ref[...]
    h = jnp.maximum(h, 0.0)
    # fused mu/logvar head: one [H, 2L] matmul, then chunk (matches torch.chunk)
    enc = jnp.dot(h.astype(bf16), w3_ref[...],
                  preferred_element_type=f32) + b3_ref[...]
    mu = enc[:, :latent]
    logvar = enc[:, latent:]

    # ---- reparameterize ----
    std = jnp.exp(0.5 * logvar)
    z = mu + eps_ref[...] * std

    # ---- decoder ----
    g = jnp.dot(z.astype(bf16), d1_ref[...],
                preferred_element_type=f32) + c1_ref[...]
    g = jnp.maximum(g, 0.0)
    g = jnp.dot(g.astype(bf16), d2_ref[...],
                preferred_element_type=f32) + c2_ref[...]
    g = jnp.maximum(g, 0.0)
    x_hat = jnp.dot(g.astype(bf16), d3_ref[...],
                    preferred_element_type=f32) + c3_ref[...]
    x_hat = jnp.maximum(x_hat, 0.0)
    xhat_ref[...] = x_hat

    # ---- losses ----
    # KL(N(mu, std) || N(0, 1)); std*std reuses the exp already computed above.
    var = std * std
    kl_elem = 0.5 * (var + mu * mu - 1.0) - 0.5 * logvar
    kl_sum = jnp.sum(kl_elem, axis=1, keepdims=True)          # (tile_b, 1)
    diff = x - x_hat
    rec_sum = jnp.sum(diff * diff, axis=1, keepdims=True)      # (tile_b, 1)

    # Lane-dense store: one full-width slab, lane 0 = rec, lane 1 = kl.
    lane = lax.broadcasted_iota(jnp.int32, loss_ref.shape, 1)
    loss_ref[...] = (jnp.where(lane == 0, rec_sum, 0.0)
                     + jnp.where(lane == 1, kl_sum, 0.0))


def scpram_forward(x, noise, eps, params, *, noise_rate=0.1, tile_b=128):
    """Fused SCPRAM forward. Returns (x_hat, loss_rec, loss_kl)."""
    B, G = x.shape
    L = eps.shape[1]
    H = params["w1"].shape[1]

    # Pad batch up to a multiple of the tile (results sliced back afterwards).
    B_pad = ((B + tile_b - 1) // tile_b) * tile_b
    if B_pad != B:
        pad = B_pad - B
        x = jnp.pad(x, ((0, pad), (0, 0)))
        noise = jnp.pad(noise, ((0, pad), (0, 0)))
        eps = jnp.pad(eps, ((0, pad), (0, 0)))

    grid = (B_pad // tile_b,)

    # index_maps receive the scalar-prefetch ref as a trailing positional arg.
    def batch_map(i, nr):
        return (i, 0)

    def fixed_map(i, nr):
        return (0, 0)

    batched_spec = lambda last: pl.BlockSpec((tile_b, last), batch_map)
    param_spec = lambda r, c: pl.BlockSpec((r, c), fixed_map)

    in_specs = [
        batched_spec(G),                          # x
        batched_spec(G),                          # noise
        batched_spec(L),                          # eps
        param_spec(G, H), param_spec(1, H),       # w1, b1
        param_spec(H, H), param_spec(1, H),       # w2, b2
        param_spec(H, 2 * L), param_spec(1, 2 * L),  # w3 (fused mu|logvar), b3
        param_spec(L, H), param_spec(1, H),       # d1, c1
        param_spec(H, H), param_spec(1, H),       # d2, c2
        param_spec(H, G), param_spec(1, G),       # d3, c3
    ]
    out_specs = (
        batched_spec(G),                          # x_hat
        batched_spec(LOSS_LANES),                 # loss slab (rec | kl | 0...)
    )
    out_shape = (
        jax.ShapeDtypeStruct((B_pad, G), jnp.float32),
        jax.ShapeDtypeStruct((B_pad, LOSS_LANES), jnp.float32),
    )

    nr_arr = jnp.full((1,), noise_rate, dtype=jnp.float32)

    x_hat, loss = pl.pallas_call(
        scpram_kernel,
        out_shape=out_shape,
        grid_spec=pltpu.PrefetchScalarGridSpec(
            num_scalar_prefetch=1,
            grid=grid,
            in_specs=in_specs,
            out_specs=out_specs,
        ),
        compiler_params=pltpu.CompilerParams(
            dimension_semantics=("parallel",)),
    )(
        nr_arr,
        x, noise, eps,
        params["w1"], params["b1"], params["w2"], params["b2"],
        params["w3"], params["b3"],
        params["d1"], params["c1"], params["d2"], params["c2"],
        params["d3"], params["c3"],
    )
    return x_hat[:B], loss[:B, 0], loss[:B, 1]


def init_params(key, input_dim, hidden_dim, latent_dim):
    """Synthetic weights (uniform ~ 1/sqrt(fan_in), like PyTorch Linear).

    Weight matrices are stored in bf16 (MXU-native), biases in f32.
    """
    keys = jax.random.split(key, 12)

    def lin(kw, kb, fan_in, fan_out):
        bound = 1.0 / np.sqrt(fan_in)
        w = jax.random.uniform(kw, (fan_in, fan_out), jnp.float32, -bound, bound)
        b = jax.random.uniform(kb, (1, fan_out), jnp.float32, -bound, bound)
        return w.astype(jnp.bfloat16), b

    p = {}
    p["w1"], p["b1"] = lin(keys[0], keys[1], input_dim, hidden_dim)
    p["w2"], p["b2"] = lin(keys[2], keys[3], hidden_dim, hidden_dim)
    p["w3"], p["b3"] = lin(keys[4], keys[5], hidden_dim, 2 * latent_dim)  # mu|logvar
    p["d1"], p["c1"] = lin(keys[6], keys[7], latent_dim, hidden_dim)
    p["d2"], p["c2"] = lin(keys[8], keys[9], hidden_dim, hidden_dim)
    p["d3"], p["c3"] = lin(keys[10], keys[11], hidden_dim, input_dim)
    return p


def scpram_forward_ref(x, noise, eps, p, noise_rate=0.1):
    """Pure-JAX reference (same bf16-matmul / f32-accumulate recipe)."""
    bf16, f32 = jnp.bfloat16, jnp.float32
    relu = lambda t: jnp.maximum(t, 0.0)
    L = eps.shape[1]

    x_noisy = x + noise * noise_rate
    h = relu(jnp.dot(x_noisy.astype(bf16), p["w1"], preferred_element_type=f32) + p["b1"])
    h = relu(jnp.dot(h.astype(bf16), p["w2"], preferred_element_type=f32) + p["b2"])
    enc = jnp.dot(h.astype(bf16), p["w3"], preferred_element_type=f32) + p["b3"]
    mu, logvar = enc[:, :L], enc[:, L:]
    std = jnp.exp(0.5 * logvar)
    z = mu + eps * std
    g = relu(jnp.dot(z.astype(bf16), p["d1"], preferred_element_type=f32) + p["c1"])
    g = relu(jnp.dot(g.astype(bf16), p["d2"], preferred_element_type=f32) + p["c2"])
    x_hat = relu(jnp.dot(g.astype(bf16), p["d3"], preferred_element_type=f32) + p["c3"])
    kl = (0.5 * (jnp.exp(logvar) + mu * mu - 1.0) - 0.5 * logvar).sum(axis=1)
    rec = ((x - x_hat) ** 2).sum(axis=1)
    return x_hat, rec, kl


if __name__ == "__main__":
    # Small-but-MXU-friendly shapes consistent with the module
    # (genes, hidden, latent scaled down; 2*latent = 128 lanes).
    B, INPUT_DIM, HIDDEN_DIM, LATENT_DIM = 256, 256, 128, 64
    NOISE_RATE = 0.1

    key = jax.random.PRNGKey(0)
    k_param, k_x, k_noise, k_eps = jax.random.split(key, 4)

    params = init_params(k_param, INPUT_DIM, HIDDEN_DIM, LATENT_DIM)
    x = jax.random.normal(k_x, (B, INPUT_DIM), jnp.float32)
    noise = jax.random.normal(k_noise, (B, INPUT_DIM), jnp.float32)   # torch.randn_like(x)
    eps = jax.random.normal(k_eps, (B, LATENT_DIM), jnp.float32)      # torch.randn_like(std)

    x_hat, loss_rec, loss_kl = scpram_forward(
        x, noise, eps, params, noise_rate=NOISE_RATE, tile_b=128)
    jax.block_until_ready((x_hat, loss_rec, loss_kl))

    # Sanity-check against a pure-JAX reference (same bf16/f32 recipe).
    x_hat_r, rec_r, kl_r = scpram_forward_ref(x, noise, eps, params, NOISE_RATE)
    np.testing.assert_allclose(np.asarray(x_hat), np.asarray(x_hat_r),
                               rtol=1e-2, atol=1e-2)
    np.testing.assert_allclose(np.asarray(loss_rec), np.asarray(rec_r),
                               rtol=1e-2, atol=1e-2)
    np.testing.assert_allclose(np.asarray(loss_kl), np.asarray(kl_r),
                               rtol=1e-2, atol=1e-2)

    print("KERNEL_OK")
</pallas_src>

<mosaic_0001>
module attributes {stable_mosaic.version = 11 : i64} {
  func.func @scpram_kernel(%arg0: i32, %arg1: memref<1xf32, #tpu.memory_space<smem>>, %arg2: memref<128x256xf32, #tpu.memory_space<vmem>>, %arg3: memref<128x256xf32, #tpu.memory_space<vmem>>, %arg4: memref<128x64xf32, #tpu.memory_space<vmem>>, %arg5: memref<256x128xbf16, #tpu.memory_space<vmem>>, %arg6: memref<1x128xf32, #tpu.memory_space<vmem>>, %arg7: memref<128x128xbf16, #tpu.memory_space<vmem>>, %arg8: memref<1x128xf32, #tpu.memory_space<vmem>>, %arg9: memref<128x128xbf16, #tpu.memory_space<vmem>>, %arg10: memref<1x128xf32, #tpu.memory_space<vmem>>, %arg11: memref<64x128xbf16, #tpu.memory_space<vmem>>, %arg12: memref<1x128xf32, #tpu.memory_space<vmem>>, %arg13: memref<128x128xbf16, #tpu.memory_space<vmem>>, %arg14: memref<1x128xf32, #tpu.memory_space<vmem>>, %arg15: memref<128x256xbf16, #tpu.memory_space<vmem>>, %arg16: memref<1x256xf32, #tpu.memory_space<vmem>>, %arg17: memref<128x256xf32, #tpu.memory_space<vmem>>, %arg18: memref<128x128xf32, #tpu.memory_space<vmem>>) attributes {dimension_semantics = [#tpu.dimension_semantics<parallel>], iteration_bounds = array<i64: 2>, scalar_prefetch = 1 : i64, scratch_operands = 0 : i64, tpu.core_type = #tpu.core_type<tc>, window_params = [{transform_indices = @transform_0, window_bounds = array<i64: 128, 256>}, {transform_indices = @transform_1, window_bounds = array<i64: 128, 256>}, {transform_indices = @transform_2, window_bounds = array<i64: 128, 64>}, {pipeline_mode = #tpu.pipeline_mode<synchronous>, transform_indices = @transform_3, window_bounds = array<i64: 256, 128>}, {pipeline_mode = #tpu.pipeline_mode<synchronous>, transform_indices = @transform_4, window_bounds = array<i64: 1, 128>}, {pipeline_mode = #tpu.pipeline_mode<synchronous>, transform_indices = @transform_5, window_bounds = array<i64: 128, 128>}, {pipeline_mode = #tpu.pipeline_mode<synchronous>, transform_indices = @transform_6, window_bounds = array<i64: 1, 128>}, {pipeline_mode = #tpu.pipeline_mode<synchronous>, transform_indices = @transform_7, window_bounds = array<i64: 128, 128>}, {pipeline_mode = #tpu.pipeline_mode<synchronous>, transform_indices = @transform_8, window_bounds = array<i64: 1, 128>}, {pipeline_mode = #tpu.pipeline_mode<synchronous>, transform_indices = @transform_9, window_bounds = array<i64: 64, 128>}, {pipeline_mode = #tpu.pipeline_mode<synchronous>, transform_indices = @transform_10, window_bounds = array<i64: 1, 128>}, {pipeline_mode = #tpu.pipeline_mode<synchronous>, transform_indices = @transform_11, window_bounds = array<i64: 128, 128>}, {pipeline_mode = #tpu.pipeline_mode<synchronous>, transform_indices = @transform_12, window_bounds = array<i64: 1, 128>}, {pipeline_mode = #tpu.pipeline_mode<synchronous>, transform_indices = @transform_13, window_bounds = array<i64: 128, 256>}, {pipeline_mode = #tpu.pipeline_mode<synchronous>, transform_indices = @transform_14, window_bounds = array<i64: 1, 256>}, {transform_indices = @transform_15, window_bounds = array<i64: 128, 256>}, {transform_indices = @transform_16, window_bounds = array<i64: 128, 128>}]} {
    %c0 = arith.constant 0 : index
    %0 = memref.load %arg1[%c0] : memref<1xf32, #tpu.memory_space<smem>>
    %c0_0 = arith.constant 0 : index
    %c0_1 = arith.constant 0 : index
    %1 = vector.load %arg2[%c0_0, %c0_1] : memref<128x256xf32, #tpu.memory_space<vmem>>, vector<128x256xf32>
    %c0_2 = arith.constant 0 : index
    %c0_3 = arith.constant 0 : index
    %2 = vector.load %arg3[%c0_2, %c0_3] : memref<128x256xf32, #tpu.memory_space<vmem>>, vector<128x256xf32>
    %3 = vector.broadcast %0 : f32 to vector<128x256xf32>
    %4 = arith.mulf %2, %3 : vector<128x256xf32>
    %5 = arith.addf %1, %4 : vector<128x256xf32>
    %6 = arith.truncf %5 : vector<128x256xf32> to vector<128x256xbf16>
    %c0_4 = arith.constant 0 : index
    %c0_5 = arith.constant 0 : index
    %7 = vector.load %arg5[%c0_4, %c0_5] : memref<256x128xbf16, #tpu.memory_space<vmem>>, vector<256x128xbf16>
    %cst = arith.constant dense<0.000000e+00> : vector<128x128xf32>
    %8 = tpu.matmul %6, %7, %cst {dimension_numbers = #tpu.dot_dimension_numbers<[1], [0], [0], [1], [0, 0, 1, 1], [], []>} : vector<128x256xbf16>, vector<256x128xbf16>, vector<128x128xf32> -> vector<128x128xf32>
    %c0_6 = arith.constant 0 : index
    %c0_7 = arith.constant 0 : index
    %9 = vector.load %arg6[%c0_6, %c0_7] : memref<1x128xf32, #tpu.memory_space<vmem>>, vector<1x128xf32>
    %10 = vector.broadcast %9 : vector<1x128xf32> to vector<128x128xf32>
    %11 = arith.addf %8, %10 : vector<128x128xf32>
    %cst_8 = arith.constant 0.000000e+00 : f32
    %12 = vector.broadcast %cst_8 : f32 to vector<128x128xf32>
    %13 = arith.maximumf %11, %12 : vector<128x128xf32>
    %14 = arith.truncf %13 : vector<128x128xf32> to vector<128x128xbf16>
    %c0_9 = arith.constant 0 : index
    %c0_10 = arith.constant 0 : index
    %15 = vector.load %arg7[%c0_9, %c0_10] : memref<128x128xbf16, #tpu.memory_space<vmem>>, vector<128x128xbf16>
    %cst_11 = arith.constant dense<0.000000e+00> : vector<128x128xf32>
    %16 = tpu.matmul %14, %15, %cst_11 {dimension_numbers = #tpu.dot_dimension_numbers<[1], [0], [0], [1], [0, 0, 1, 1], [], []>} : vector<128x128xbf16>, vector<128x128xbf16>, vector<128x128xf32> -> vector<128x128xf32>
    %c0_12 = arith.constant 0 : index
    %c0_13 = arith.constant 0 : index
    %17 = vector.load %arg8[%c0_12, %c0_13] : memref<1x128xf32, #tpu.memory_space<vmem>>, vector<1x128xf32>
    %18 = vector.broadcast %17 : vector<1x128xf32> to vector<128x128xf32>
    %19 = arith.addf %16, %18 : vector<128x128xf32>
    %cst_14 = arith.constant 0.000000e+00 : f32
    %20 = vector.broadcast %cst_14 : f32 to vector<128x128xf32>
    %21 = arith.maximumf %19, %20 : vector<128x128xf32>
    %22 = arith.truncf %21 : vector<128x128xf32> to vector<128x128xbf16>
    %c0_15 = arith.constant 0 : index
    %c0_16 = arith.constant 0 : index
    %23 = vector.load %arg9[%c0_15, %c0_16] : memref<128x128xbf16, #tpu.memory_space<vmem>>, vector<128x128xbf16>
    %cst_17 = arith.constant dense<0.000000e+00> : vector<128x128xf32>
    %24 = tpu.matmul %22, %23, %cst_17 {dimension_numbers = #tpu.dot_dimension_numbers<[1], [0], [0], [1], [0, 0, 1, 1], [], []>} : vector<128x128xbf16>, vector<128x128xbf16>, vector<128x128xf32> -> vector<128x128xf32>
    %c0_18 = arith.constant 0 : index
    %c0_19 = arith.constant 0 : index
    %25 = vector.load %arg10[%c0_18, %c0_19] : memref<1x128xf32, #tpu.memory_space<vmem>>, vector<1x128xf32>
    %26 = vector.broadcast %25 : vector<1x128xf32> to vector<128x128xf32>
    %27 = arith.addf %24, %26 : vector<128x128xf32>
    %28 = vector.extract_strided_slice %27 {offsets = [0, 0], sizes = [128, 64], strides = [1, 1]} : vector<128x128xf32> to vector<128x64xf32>
    %29 = vector.extract_strided_slice %27 {offsets = [0, 64], sizes = [128, 64], strides = [1, 1]} : vector<128x128xf32> to vector<128x64xf32>
    %cst_20 = arith.constant 5.000000e-01 : f32
    %30 = vector.broadcast %cst_20 : f32 to vector<128x64xf32>
    %31 = arith.mulf %30, %29 : vector<128x64xf32>
    %32 = math.exp %31 : vector<128x64xf32>
    %c0_21 = arith.constant 0 : index
    %c0_22 = arith.constant 0 : index
    %33 = vector.load %arg4[%c0_21, %c0_22] : memref<128x64xf32, #tpu.memory_space<vmem>>, vector<128x64xf32>
    %34 = arith.mulf %33, %32 : vector<128x64xf32>
    %35 = arith.addf %28, %34 : vector<128x64xf32>
    %36 = arith.truncf %35 : vector<128x64xf32> to vector<128x64xbf16>
    %c0_23 = arith.constant 0 : index
    %c0_24 = arith.constant 0 : index
    %37 = vector.load %arg11[%c0_23, %c0_24] : memref<64x128xbf16, #tpu.memory_space<vmem>>, vector<64x128xbf16>
    %cst_25 = arith.constant dense<0.000000e+00> : vector<128x128xf32>
    %38 = tpu.matmul %36, %37, %cst_25 {dimension_numbers = #tpu.dot_dimension_numbers<[1], [0], [0], [1], [0, 0, 1, 1], [], []>} : vector<128x64xbf16>, vector<64x128xbf16>, vector<128x128xf32> -> vector<128x128xf32>
    %c0_26 = arith.constant 0 : index
    %c0_27 = arith.constant 0 : index
    %39 = vector.load %arg12[%c0_26, %c0_27] : memref<1x128xf32, #tpu.memory_space<vmem>>, vector<1x128xf32>
    %40 = vector.broadcast %39 : vector<1x128xf32> to vector<128x128xf32>
    %41 = arith.addf %38, %40 : vector<128x128xf32>
    %cst_28 = arith.constant 0.000000e+00 : f32
    %42 = vector.broadcast %cst_28 : f32 to vector<128x128xf32>
    %43 = arith.maximumf %41, %42 : vector<128x128xf32>
    %44 = arith.truncf %43 : vector<128x128xf32> to vector<128x128xbf16>
    %c0_29 = arith.constant 0 : index
    %c0_30 = arith.constant 0 : index
    %45 = vector.load %arg13[%c0_29, %c0_30] : memref<128x128xbf16, #tpu.memory_space<vmem>>, vector<128x128xbf16>
    %cst_31 = arith.constant dense<0.000000e+00> : vector<128x128xf32>
    %46 = tpu.matmul %44, %45, %cst_31 {dimension_numbers = #tpu.dot_dimension_numbers<[1], [0], [0], [1], [0, 0, 1, 1], [], []>} : vector<128x128xbf16>, vector<128x128xbf16>, vector<128x128xf32> -> vector<128x128xf32>
    %c0_32 = arith.constant 0 : index
    %c0_33 = arith.constant 0 : index
    %47 = vector.load %arg14[%c0_32, %c0_33] : memref<1x128xf32, #tpu.memory_space<vmem>>, vector<1x128xf32>
    %48 = vector.broadcast %47 : vector<1x128xf32> to vector<128x128xf32>
    %49 = arith.addf %46, %48 : vector<128x128xf32>
    %cst_34 = arith.constant 0.000000e+00 : f32
    %50 = vector.broadcast %cst_34 : f32 to vector<128x128xf32>
    %51 = arith.maximumf %49, %50 : vector<128x128xf32>
    %52 = arith.truncf %51 : vector<128x128xf32> to vector<128x128xbf16>
    %c0_35 = arith.constant 0 : index
    %c0_36 = arith.constant 0 : index
    %53 = vector.load %arg15[%c0_35, %c0_36] : memref<128x256xbf16, #tpu.memory_space<vmem>>, vector<128x256xbf16>
    %cst_37 = arith.constant dense<0.000000e+00> : vector<128x256xf32>
    %54 = tpu.matmul %52, %53, %cst_37 {dimension_numbers = #tpu.dot_dimension_numbers<[1], [0], [0], [1], [0, 0, 1, 1], [], []>} : vector<128x128xbf16>, vector<128x256xbf16>, vector<128x256xf32> -> vector<128x256xf32>
    %c0_38 = arith.constant 0 : index
    %c0_39 = arith.constant 0 : index
    %55 = vector.load %arg16[%c0_38, %c0_39] : memref<1x256xf32, #tpu.memory_space<vmem>>, vector<1x256xf32>
    %56 = vector.broadcast %55 : vector<1x256xf32> to vector<128x256xf32>
    %57 = arith.addf %54, %56 : vector<128x256xf32>
    %cst_40 = arith.constant 0.000000e+00 : f32
    %58 = vector.broadcast %cst_40 : f32 to vector<128x256xf32>
    %59 = arith.maximumf %57, %58 : vector<128x256xf32>
    %c0_41 = arith.constant 0 : index
    %c0_42 = arith.constant 0 : index
    %60 = vector.load %arg17[%c0_41, %c0_42] : memref<128x256xf32, #tpu.memory_space<vmem>>, vector<128x256xf32>
    tpu.vector_store %arg17[%c0_41, %c0_42], %59 {strides = array<i32>} : memref<128x256xf32, #tpu.memory_space<vmem>>, vector<128x256xf32>,
    %61 = arith.mulf %32, %32 : vector<128x64xf32>
    %62 = arith.mulf %28, %28 : vector<128x64xf32>
    %63 = arith.addf %61, %62 : vector<128x64xf32>
    %cst_43 = arith.constant 1.000000e+00 : f32
    %64 = vector.broadcast %cst_43 : f32 to vector<128x64xf32>
    %65 = arith.subf %63, %64 : vector<128x64xf32>
    %cst_44 = arith.constant 5.000000e-01 : f32
    %66 = vector.broadcast %cst_44 : f32 to vector<128x64xf32>
    %67 = arith.mulf %66, %65 : vector<128x64xf32>
    %cst_45 = arith.constant 5.000000e-01 : f32
    %68 = vector.broadcast %cst_45 : f32 to vector<128x64xf32>
    %69 = arith.mulf %68, %29 : vector<128x64xf32>
    %70 = arith.subf %67, %69 : vector<128x64xf32>
    %cst_46 = arith.constant dense<0.000000e+00> : vector<128xf32>
    %71 = vector.multi_reduction <add>, %70, %cst_46 [1] : vector<128x64xf32> to vector<128xf32>
    %72 = vector.shape_cast %71 : vector<128xf32> to vector<128x1xf32>
    %73 = arith.subf %1, %59 : vector<128x256xf32>
    %74 = arith.mulf %73, %73 : vector<128x256xf32>
    %cst_47 = arith.constant dense<0.000000e+00> : vector<128xf32>
    %75 = vector.multi_reduction <add>, %74, %cst_47 [1] : vector<128x256xf32> to vector<128xf32>
    %76 = vector.shape_cast %75 : vector<128xf32> to vector<128x1xf32>
    %77 = tpu.iota {dimensions = array<i32: 1>} : vector<128x128xi32>
    %c0_i32 = arith.constant 0 : i32
    %78 = vector.broadcast %c0_i32 : i32 to vector<128x128xi32>
    %79 = arith.cmpi eq, %77, %78 : vector<128x128xi32>
    %cst_48 = arith.constant 0.000000e+00 : f32
    %80 = vector.shape_cast %76 : vector<128x1xf32> to vector<128x1xf32>
    %81 = vector.broadcast %80 : vector<128x1xf32> to vector<128x128xf32>
    %82 = vector.broadcast %cst_48 : f32 to vector<128x128xf32>
    %83 = arith.select %79, %81, %82 : vector<128x128xi1>, vector<128x128xf32>
    %c1_i32 = arith.constant 1 : i32
    %84 = vector.broadcast %c1_i32 : i32 to vector<128x128xi32>
    %85 = arith.cmpi eq, %77, %84 : vector<128x128xi32>
    %cst_49 = arith.constant 0.000000e+00 : f32
    %86 = vector.shape_cast %72 : vector<128x1xf32> to vector<128x1xf32>
    %87 = vector.broadcast %86 : vector<128x1xf32> to vector<128x128xf32>
    %88 = vector.broadcast %cst_49 : f32 to vector<128x128xf32>
    %89 = arith.select %85, %87, %88 : vector<128x128xi1>, vector<128x128xf32>
    %90 = arith.addf %83, %89 : vector<128x128xf32>
    %c0_50 = arith.constant 0 : index
    %c0_51 = arith.constant 0 : index
    %91 = vector.load %arg18[%c0_50, %c0_51] : memref<128x128xf32, #tpu.memory_space<vmem>>, vector<128x128xf32>
    tpu.vector_store %arg18[%c0_50, %c0_51], %90 {strides = array<i32>} : memref<128x128xf32, #tpu.memory_space<vmem>>, vector<128x128xf32>,
    return
  }
  func.func @transform_0(%arg0: i32, %arg1: memref<1xf32, #tpu.memory_space<smem>>) -> (i32, i32) {
    %c0_i32 = arith.constant 0 : i32
    %c0_i32_0 = arith.constant 0 : i32
    return %arg0, %c0_i32 : i32, i32
  }
  func.func @transform_1(%arg0: i32, %arg1: memref<1xf32, #tpu.memory_space<smem>>) -> (i32, i32) {
    %c0_i32 = arith.constant 0 : i32
    %c0_i32_0 = arith.constant 0 : i32
    return %arg0, %c0_i32 : i32, i32
  }
  func.func @transform_2(%arg0: i32, %arg1: memref<1xf32, #tpu.memory_space<smem>>) -> (i32, i32) {
    %c0_i32 = arith.constant 0 : i32
    %c0_i32_0 = arith.constant 0 : i32
    return %arg0, %c0_i32 : i32, i32
  }
  func.func @transform_3(%arg0: i32, %arg1: memref<1xf32, #tpu.memory_space<smem>>) -> (i32, i32) {
    %c0_i32 = arith.constant 0 : i32
    %c0_i32_0 = arith.constant 0 : i32
    %c0_i32_1 = arith.constant 0 : i32
    return %c0_i32, %c0_i32_0 : i32, i32
  }
  func.func @transform_4(%arg0: i32, %arg1: memref<1xf32, #tpu.memory_space<smem>>) -> (i32, i32) {
    %c0_i32 = arith.constant 0 : i32
    %c0_i32_0 = arith.constant 0 : i32
    %c0_i32_1 = arith.constant 0 : i32
    return %c0_i32, %c0_i32_0 : i32, i32
  }
  func.func @transform_5(%arg0: i32, %arg1: memref<1xf32, #tpu.memory_space<smem>>) -> (i32, i32) {
    %c0_i32 = arith.constant 0 : i32
    %c0_i32_0 = arith.constant 0 : i32
    %c0_i32_1 = arith.constant 0 : i32
    return %c0_i32, %c0_i32_0 : i32, i32
  }
  func.func @transform_6(%arg0: i32, %arg1: memref<1xf32, #tpu.memory_space<smem>>) -> (i32, i32) {
    %c0_i32 = arith.constant 0 : i32
    %c0_i32_0 = arith.constant 0 : i32
    %c0_i32_1 = arith.constant 0 : i32
    return %c0_i32, %c0_i32_0 : i32, i32
  }
  func.func @transform_7(%arg0: i32, %arg1: memref<1xf32, #tpu.memory_space<smem>>) -> (i32, i32) {
    %c0_i32 = arith.constant 0 : i32
    %c0_i32_0 = arith.constant 0 : i32
    %c0_i32_1 = arith.constant 0 : i32
    return %c0_i32, %c0_i32_0 : i32, i32
  }
  func.func @transform_8(%arg0: i32, %arg1: memref<1xf32, #tpu.memory_space<smem>>) -> (i32, i32) {
    %c0_i32 = arith.constant 0 : i32
    %c0_i32_0 = arith.constant 0 : i32
    %c0_i32_1 = arith.constant 0 : i32
    return %c0_i32, %c0_i32_0 : i32, i32
  }
  func.func @transform_9(%arg0: i32, %arg1: memref<1xf32, #tpu.memory_space<smem>>) -> (i32, i32) {
    %c0_i32 = arith.constant 0 : i32
    %c0_i32_0 = arith.constant 0 : i32
    %c0_i32_1 = arith.constant 0 : i32
    return %c0_i32, %c0_i32_0 : i32, i32
  }
  func.func @transform_10(%arg0: i32, %arg1: memref<1xf32, #tpu.memory_space<smem>>) -> (i32, i32) {
    %c0_i32 = arith.constant 0 : i32
    %c0_i32_0 = arith.constant 0 : i32
    %c0_i32_1 = arith.constant 0 : i32
    return %c0_i32, %c0_i32_0 : i32, i32
  }
  func.func @transform_11(%arg0: i32, %arg1: memref<1xf32, #tpu.memory_space<smem>>) -> (i32, i32) {
    %c0_i32 = arith.constant 0 : i32
    %c0_i32_0 = arith.constant 0 : i32
    %c0_i32_1 = arith.constant 0 : i32
    return %c0_i32, %c0_i32_0 : i32, i32
  }
  func.func @transform_12(%arg0: i32, %arg1: memref<1xf32, #tpu.memory_space<smem>>) -> (i32, i32) {
    %c0_i32 = arith.constant 0 : i32
    %c0_i32_0 = arith.constant 0 : i32
    %c0_i32_1 = arith.constant 0 : i32
    return %c0_i32, %c0_i32_0 : i32, i32
  }
  func.func @transform_13(%arg0: i32, %arg1: memref<1xf32, #tpu.memory_space<smem>>) -> (i32, i32) {
    %c0_i32 = arith.constant 0 : i32
    %c0_i32_0 = arith.constant 0 : i32
    %c0_i32_1 = arith.constant 0 : i32
    return %c0_i32, %c0_i32_0 : i32, i32
  }
  func.func @transform_14(%arg0: i32, %arg1: memref<1xf32, #tpu.memory_space<smem>>) -> (i32, i32) {
    %c0_i32 = arith.constant 0 : i32
    %c0_i32_0 = arith.constant 0 : i32
    %c0_i32_1 = arith.constant 0 : i32
    return %c0_i32, %c0_i32_0 : i32, i32
  }
  func.func @transform_15(%arg0: i32, %arg1: memref<1xf32, #tpu.memory_space<smem>>) -> (i32, i32) {
    %c0_i32 = arith.constant 0 : i32
    %c0_i32_0 = arith.constant 0 : i32
    return %arg0, %c0_i32 : i32, i32
  }
  func.func @transform_16(%arg0: i32, %arg1: memref<1xf32, #tpu.memory_space<smem>>) -> (i32, i32) {
    %c0_i32 = arith.constant 0 : i32
    %c0_i32_0 = arith.constant 0 : i32
    return %arg0, %c0_i32 : i32, i32
  }
}

</mosaic_0001>

<bundles_post_ra>
// kernel: tpu_custom_call.1
= control target key start
LH: loop header
LB: loop body
LE: loop exit
PB: predicated region body
PF: predicated region fallthrough
CT: control target
= control target key end

     0   :  { %s4690_s0 = inlined_call_operand.<no memory space> [shape: f32[1], index: 0, kind: input, shape index: {}]   ;;  %s4691_s1 = inlined_call_operand.hbm [shape: f32[256,256], index: 1, kind: input, shape index: {}]   ;;  %s4692_s2 = inlined_call_operand.hbm [shape: f32[256,256], index: 2, kind: input, shape index: {}]   ;;  %s4693_s3 = inlined_call_operand.vmem [shape: f32[256,64], index: 3, kind: input, shape index: {}]   ;;  %s4694_s4 = inlined_call_operand.vmem [shape: bf16[256,128], index: 4, kind: input, shape index: {}]   ;;  %s4695_s5 = inlined_call_operand.vmem [shape: f32[1,128], index: 5, kind: input, shape index: {}]   ;;  %s4696_s6 = inlined_call_operand.vmem [shape: bf16[128,128], index: 6, kind: input, shape index: {}]   ;;  %s4697_s7 = inlined_call_operand.vmem [shape: f32[1,128], index: 7, kind: input, shape index: {}]   ;;  %s4698_s8 = inlined_call_operand.vmem [shape: bf16[128,128], index: 8, kind: input, shape index: {}]   ;;  %s4699_s9 = inlined_call_operand.vmem [shape: f32[1,128], index: 9, kind: input, shape index: {}]   ;;  %s4700_s10 = inlined_call_operand.hbm [shape: bf16[64,128], index: 10, kind: input, shape index: {}]   ;;  %s4701_s11 = inlined_call_operand.vmem [shape: f32[1,128], index: 11, kind: input, shape index: {}]   ;;  %s4702_s12 = inlined_call_operand.hbm [shape: bf16[128,128], index: 12, kind: input, shape index: {}]   ;;  %s4703_s13 = inlined_call_operand.vmem [shape: f32[1,128], index: 13, kind: input, shape index: {}]   ;;  %s4704_s14 = inlined_call_operand.vmem [shape: bf16[128,256], index: 14, kind: input, shape index: {}]   ;;  %s4705_s15 = inlined_call_operand.vmem [shape: f32[1,256], index: 15, kind: input, shape index: {}]   ;;  %s4706_s16 = inlined_call_operand.hbm [shape: f32[256,256], index: 16, kind: output, shape index: {0}]   ;;  %s4707_s17 = inlined_call_operand.hbm [shape: f32[256,128], index: 17, kind: output, shape index: {1}]  }
   0x1   :  { %4721 = sst [smem:[#allocation27_spill]] %s4690_s0 }
   0x2   :  { %4722 = sst [smem:[#allocation28_spill]] %s4691_s1 }
   0x3   :  { %4723 = sst [smem:[#allocation29_spill]] %s4700_s10 }
   0x4   :  { %4724 = sst [smem:[#allocation30_spill]] %s4701_s11 }
   0x5   :  { %4725 = sst [smem:[#allocation31_spill]] %s4702_s12 }
   0x6   :  { %4726 = sst [smem:[#allocation32_spill]] %s4703_s13 }
   0x7   :  { %4727 = sst [smem:[#allocation33_spill]] %s4704_s14 }
   0x8   :  { %4728 = sst [smem:[#allocation34_spill]] %s4705_s15 }
   0x9   :  { %4729 = sst [smem:[#allocation35_spill]] %s4706_s16 }
   0xa   :  { %4730 = sst [smem:[#allocation36_spill]] %s4707_s17 }
   0xb   :  { %s4731_s26 = sld [smem:[#allocation27_spill]] }
  0x11   :  { %23 = sst [smem:[#allocation3]] %s4731_s26 }
  0x12   :  { %24 = vsyncpa [#allocation5], 0 }
  0x13   :  { %26 = vsyncpa [#allocation5 + $0x1], 0 }
  0x14   :  { %27 = vsyncpa [#allocation8], 0 }
  0x15   :  { %29 = vsyncpa [#allocation8 + $0x1], 0 }
  0x16   :  { %30 = vsyncpa [#allocation11], 0 }
  0x17   :  { %31 = vsyncpa [#allocation6], 0 }
  0x18   :  { %33 = vsyncpa [#allocation6 + $0x1], 0 }
  0x19   :  { %34 = vsyncpa [#allocation14], 0 }
  0x1a   :  { %36 = vsyncpa [#allocation14 + $0x1], 0  ;;  %s3528_s27 = smov 0   ;;  %s3530_s28 = smov 0  }
  0x1b   :  { %s3532_s29 = smov 0   ;;  %s3534_s0 = smov 0  }
  0x1c LB: > { %4732 = sst [smem:[#allocation21_spill]] %s3410_s27  ;;  %s3549_s30 = sadd.s32 4294967295, %s3422_s0   ;;  %s3422_s0 = sphi %s3534_s0, %s4758_s0   ;;  %s3418_s29 = sphi %s3532_s29, %s4760_s29   ;;  %s3414_s28 = sphi %s3530_s28, %s4762_s28   ;;  %s3410_s27 = sphi %s3528_s27, %s4761_s27  }
  0x1d   : > { %4733 = sst [smem:[#allocation22_spill]] %s3418_s29  ;;  %s2675_s18 = sadd.s32 4294967294, %s3422_s0  }
  0x1e   : > { %p62_p0 = scmp.ne.s32.totalorder %s3414_s28, %s3410_s27  ;;  %p63_p1 = scmp.eq.s32.totalorder %s3549_s30, 0 }
  0x1f   : > { %p390_p2 = scmp.eq.s32.totalorder %s3549_s30, 1  ;;  %p396_p3 = scmp.eq.s32.totalorder %s2675_s18, 1 }
  0x20   : > { %p3558_p4 = por %p63_p1, %p62_p0  ;;  %p2676_p5 = scmp.ge.s32.totalorder %s3422_s0, 1 }
  0x21   : > { %p3563_p6 = por %p396_p3, %p62_p0  ;;  %p429_p7 = scmp.lt.s32.totalorder %s3422_s0, 3 }
  0x22   : > { %s4737_s10 = sld [smem:[#allocation29_spill]]  ;;  %s3424_s24 = smov [#allocation9]  }
  0x23   : > { %s4735_s1 = scalar_select %p3563_p6, 1, 0 }
  0x24   : > { %p3571_p8 = pnand %p2676_p5, %p429_p7  ;;  %s460_s25 = sshll.u32 %s3424_s24, 4  ;;  %s461_s25 = int_to_ptr.vmem [resolvable:$true] %s460_s25 }
  0x25   : > { %4736 = sst [smem:[#allocation23_spill]] %s4735_s1  ;;  %s3425_s21 = smov 64  }
  0x26   : > { %p3053_p9 = pneg %p3571_p8  ;;  %s4739_s12 = sld [smem:[#allocation31_spill]] }
  0x27   : > { %s3427_s24 = smov [#allocation10]   ;;  %s3584_s27 = sadd.s32 1, %s3422_s0  }
  0x28   : > { %s458_s22 = sshll.u32 %s4737_s10, 4  ;;  %p3054_p10 = pnand %p3053_p9, %p63_p1  ;;  %s459_s22 = int_to_ptr.hbm [resolvable:$true] %s458_s22 }
  0x29   : > { %s3426_s10 = smov 4   ;;  %s477_s1 = sshll.u32 %s3427_s24, 4  ;;  %s478_s1 = int_to_ptr.vmem [resolvable:$true] %s477_s1 }
  0x2a   : > { %3056 = dma.hbm_to_vmem [thread:$0]  (!%p3054_p10), %s459_s22, 512, %s461_s25, [#allocation8], %s3425_s21, %s3425_s21, %s3426_s10  }
  0x2b   : > { %4740 = sst [smem:[#allocation24_spill]] %s3584_s27  ;;  %s49_s17 = sadd.s32 1, %s3418_s29 }
  0x2c   : > { %s475_s20 = sshll.u32 %s4739_s12, 4  ;;  %s46_s26 = ssub.s32 %s3422_s0, %s3584_s27  ;;  %s476_s20 = int_to_ptr.hbm [resolvable:$true] %s475_s20 }
  0x2d   : > { %3059 = dma.hbm_to_vmem [thread:$0]  (!%p3054_p10), %s476_s20, 1024, %s478_s1, [#allocation11], %s3425_s21, %s3425_s21, %s3426_s10  }
  0x2e   : > { %p56_p12 = scmp.ne.s32.totalorder %s3418_s29, %s3414_s28  ;;  %p47_p13 = scmp.eq.s32.totalorder %s46_s26, 0 }
  0x2f   : > { %p57_p0 = scmp.eq.s32.totalorder %s3422_s0, 0  ;;  %p3076_p5 = scmp.lt.s32.totalorder %s3422_s0, 2 }
  0x30   : > { %p3594_p3 = por %p390_p2, %p56_p12  ;;  %s500_s25 = sand.u32 1, %s3418_s29  }
  0x31   : > { %s3600_s22 = scalar_select %p47_p13, %s3418_s29, %s49_s17  }
  0x32   : > { %s4741_s18 = scalar_select %p3594_p3, 1, 0 }
  0x33   : > { %4743 = sst [smem:[#allocation26_spill]] %s3600_s22  ;;  %p58_p7 = por %p57_p0, %p56_p12 }
  0x34   : > { %4742 = sst [smem:[#allocation25_spill]] %s4741_s18  ;;  %s3603_s24 = sshll.u32 %s500_s25, 8 }
  0x35   : > { %s4718_s10 = sshll.u32 %s3422_s0, 8  ;;  %s4744_s21 = sld [smem:[#allocation28_spill]] }
  0x36   : > { %s504_s12 = scalar_lea.vmem [#allocation4], %s3603_s24  ;;  %p3612_p2 = pnand %p3076_p5, %p58_p7 }
  0x37   : > { %s513_s27 = sshll.u32 %s504_s12, 4  ;;  %s501_s17 = scalar_lea.sflag [#allocation5], %s500_s25  ;;  %s514_s27 = int_to_ptr.vmem [resolvable:$true] %s513_s27 }
  0x38   : > { %p3256_p10 = pneg %p3612_p2 }
  0x3b   : > { %s510_s26 = scalar_lea.hbm %s4744_s21, %s4718_s10  ;;  %s3259_s20 = scalar_lea.hbm %s4744_s21, 512 }
  0x3c   : > { %s511_s16 = sshll.u32 %s510_s26, 4  ;;  %s512_s16 = int_to_ptr.hbm [resolvable:$true] %s511_s16 }
  0x3d   : > { %s3252_s22 = sshra.s32 %s512_s16, 4  ;;  %s3253_s22 = int_to_ptr.hbm [resolvable:$true] %s3252_s22 }
  0x3e   : > { %s3254_s29 = scalar_lea.hbm %s3253_s22, 256  ;;  %p3260_p0 = scmp.lt.s32.totalorder %s3253_s22, %s4744_s21 }
  0x3f   : > { %p3255_p9 = scmp.ne.s32.totalorder %s3253_s22, %s3254_s29  ;;  %p3261_p5 = scmp.lt.s32.totalorder %s3259_s20, %s3254_s29 }
  0x41   : > { %p3257_p12 = pnand %p3256_p10, %p3255_p9  ;;  %p3262_p7 = por %p3261_p5, %p3260_p0 }
  0x43   : > { %p3258_p13 = pneg %p3257_p12 }
  0x45   : > { %p3263_p11 = pnand %p3262_p7, %p3258_p13 }
  0x47   : > { %3266 = shalt.err (!%p3263_p11)
}
  0x48   : > { %s3428_s25 = smov 256   ;;  %s3429_s15 = smov 16  }
  0x49   : > { %3063 = dma.hbm_to_vmem [thread:$0]  (!%p3612_p2), %s512_s16, 4096, %s514_s27, %s501_s17, %s3428_s25, %s3428_s25, %s3429_s15  }
  0x4a   : > { %s4746_s13 = sshll.u32 %s3422_s0, 8  ;;  %s527_s10 = scalar_lea.vmem [#allocation7], %s3603_s24 }
  0x4b   : > { %s533_s11 = scalar_lea.hbm %s4692_s2, %s4746_s13  ;;  %s536_s22 = sshll.u32 %s527_s10, 4  ;;  %s537_s22 = int_to_ptr.vmem [resolvable:$true] %s536_s22 }
  0x4c   : > { %s534_s29 = sshll.u32 %s533_s11, 4  ;;  %s523_s20 = sand.u32 1, %s3422_s0   ;;  %s535_s29 = int_to_ptr.hbm [resolvable:$true] %s534_s29 }
  0x4d   : > { %s524_s26 = scalar_lea.sflag [#allocation8], %s523_s20  ;;  %s3282_s21 = sshra.s32 %s535_s29, 4  ;;  %s3283_s21 = int_to_ptr.hbm [resolvable:$true] %s3282_s21 }
  0x4e   : > { %s3284_s14 = scalar_lea.hbm %s3283_s21, 256  ;;  %s3289_s17 = scalar_lea.hbm %s4692_s2, 512 }
  0x4f   : > { %p3285_p11 = scmp.ne.s32.totalorder %s3283_s21, %s3284_s14  ;;  %p3290_p13 = scmp.lt.s32.totalorder %s3283_s21, %s4692_s2 }
  0x50   : > { %p3291_p0 = scmp.lt.s32.totalorder %s3289_s17, %s3284_s14 }
  0x51   : > { %p3287_p9 = pnand %p3285_p11, %p3256_p10 }
  0x52   : > { %p3292_p5 = por %p3291_p0, %p3290_p13 }
  0x53   : > { %p3288_p12 = pneg %p3287_p9 }
  0x55   : > { %p3293_p7 = pnand %p3292_p5, %p3288_p12 }
  0x57   : > { %3296 = shalt.err (!%p3293_p7)
}
  0x58   : > { %3066 = dma.hbm_to_vmem [thread:$0]  (!%p3612_p2), %s535_s29, 4096, %s537_s22, %s524_s26, %s3428_s25, %s3428_s25, %s3429_s15  }
  0x59   : > { %557 = sbr.rel (%p3571_p8) target bundleno = 1362 (0x552), region = 80  ;;  %s3650_s11 = sand.u32 (!%p3571_p8), 1, %s3414_s28  }
  0x5a   : > { %s3653_s12 = sshll.u32 (!%p3571_p8), %s3650_s11, 8  ;;  %s560_s21 = scalar_lea.sflag (!%p3571_p8), [#allocation5], %s3650_s11 }
  0x5b   : > { %s3657_s14 = scalar_lea.vmem (!%p3571_p8), [#allocation4], %s3653_s12 }
  0x5e   : > { %3385 = dma.done.wait (%p3558_p4), %s560_s21, 4096  }
  0x5f   : > { %3387 = vsyncadd (%p3558_p4), %s560_s21, 4294963200  ;;  %s569_s15 = sand.u32 1, %s3549_s30   ;;  %s3665_s18 = scalar_lea.vmem [#allocation7], %s3653_s12 }
  0x60   : > { %s570_s23 = scalar_lea.sflag [#allocation8], %s569_s15 }
  0x61   : > { %3389 = dma.done.wait (%p3558_p4), %s570_s23, 4096  }
  0x62   : > { %3391 = vsyncadd (%p3558_p4), %s570_s23, 4294963200 }
  0x63   : > { %3393 = dma.done.wait (%p63_p1), [#allocation8], 512  }
  0x64   : > { %3395 = vsyncadd (%p63_p1), [#allocation8], 4294966784 }
  0x65   : > { %3397 = dma.done.wait (%p63_p1), [#allocation11], 1024  }
  0x66   : > { %3399 = vsyncadd (%p63_p1), [#allocation11], 4294966272  ;;  %v2981_v0 = vld [vmem:[%s4694_s4 + $0x38] sm:$0xff]  ;;  %v2980_v2 = vld [vmem:[%s4694_s4 + $0x30] sm:$0xff]  ;;  %s659_s25 = sld [smem:[#allocation3]]  ;;  %s3430_s29 = smov 64  }
  0x67   : > { %v2989_v1 = vld [vmem:[%s4694_s4 + $0x78] sm:$0xff]  ;;  %937 = vmatpush.bf16.msra.mxu0 %v2981_v0  ;;  %v2988_v3 = vld [vmem:[%s4694_s4 + $0x70] sm:$0xff]  ;;  %v2979_v4 = vld [vmem:[%s4694_s4 + $0x28] sm:$0xff]  ;;  %s2695_s20 = sshll.u32 %s3549_s30, 4  ;;  %vm1521_vm0 = vcmask 523264   ;;  %s4747_s21 = sld [smem:[#allocation33_spill]] }
  0x68   : > { %986 = vmatpush.bf16.msra.mxu1 %v2989_v1  ;;  %v2987_v5 = vld [vmem:[%s4694_s4 + $0x68] sm:$0xff]  ;;  %v2978_v6 = vld [vmem:[%s4694_s4 + $0x20] sm:$0xff]  ;;  %v2977_v8 = vld [vmem:[%s4694_s4 + $0x18] sm:$0xff]  ;;  %p651_p1 = scmp.lt.s32.totalorder %s2695_s20, 31  ;;  %s4749_s1 = sld [smem:[#allocation32_spill]] }
  0x69   : > { %v2986_v7 = vld [vmem:[%s4694_s4 + $0x60] sm:$0xff]  ;;  %v2985_v9 = vld [vmem:[%s4694_s4 + $0x58] sm:$0xff]  ;;  %v2976_v10 = vld [vmem:[%s4694_s4 + $0x10] sm:$0xff]  ;;  %s4750_s19 = sld [smem:[#allocation34_spill]] }
  0x6a   : > { %v2984_v11 = vld [vmem:[%s4694_s4 + $0x50] sm:$0xff]  ;;  %v692_v12 = vld [vmem:[%s3665_s18] sm:$0xff]  ;;  %v693_v15 = vld [vmem:[%s3665_s18 + $0x8] sm:$0xff]  ;;  %s4764_s20 = smov (!%p651_p1, %s2695_s20), 31 }
  0x6b   : > { %938 = vmatpush.bf16.msra.mxu0 %v2980_v2  ;;  %v694_v13 = vld [vmem:[%s3665_s18 + $0x10] sm:$0xff]  ;;  %v695_v16 = vld [vmem:[%s3665_s18 + $0x18] sm:$0xff]  ;;  %v2975_v17 = vld [vmem:[%s4694_s4 + $0x8] sm:$0xff]  ;;  %s2696_s26 = sshll.u32 %s4764_s20, 3  ;;  %s4748_s20 = sld [smem:[#allocation30_spill]] }
  0x6c   : > { %987 = vmatpush.bf16.msra.mxu1 %v2988_v3  ;;  %v3717_v14 = vstv %s659_s25  ;;  %v2983_v18 = vld [vmem:[%s4694_s4 + $0x48] sm:$0xff]  ;;  %v660_v19 = vld [vmem:[%s3657_s14] sm:$0xff]  ;;  %v662_v24 = vld [vmem:[%s3657_s14 + $0x10] sm:$0xff]  ;;  %s4081_s17 = scalar_lea.vmem %s4693_s3, %s2696_s26  ;;  %s2694_s26 = sshll.u32 %s3650_s11, 7 }
  0x6d   : > { %v725_v20 = vmul.f32 %v3717_v14, %v692_v12  ;;  %v727_v21 = vmul.f32 %v3717_v14, %v694_v13  ;;  %v726_v22 = vmul.f32 %v3717_v14, %v693_v15  ;;  %v728_v23 = vmul.f32 %v3717_v14, %v695_v16  ;;  %v661_v25 = vld [vmem:[%s3657_s14 + $0x8] sm:$0xff]  ;;  %v663_v26 = vld [vmem:[%s3657_s14 + $0x18] sm:$0xff]  ;;  %v2974_v31 = vld [vmem:[%s4694_s4] sm:$0xff] }
  0x6e   : > { %v2982_v32 = vld [vmem:[%s4694_s4 + $0x40] sm:$0xff]  ;;  %v698_v36 = vld [vmem:[%s3665_s18 + $0x30] sm:$0xff]  ;;  %v697_v37 = vld [vmem:[%s3665_s18 + $0x28] sm:$0xff] }
  0x6f   : > { %939 = vmatpush.bf16.msra.mxu0 %v2979_v4  ;;  %v757_v27 = vadd.f32 %v725_v20, %v660_v19  ;;  %v759_v28 = vadd.f32 %v727_v21, %v662_v24  ;;  %v758_v29 = vadd.f32 %v726_v22, %v661_v25  ;;  %v760_v30 = vadd.f32 %v728_v23, %v663_v26  ;;  %v696_v35 = vld [vmem:[%s3665_s18 + $0x20] sm:$0xff]  ;;  %v699_v38 = vld [vmem:[%s3665_s18 + $0x38] sm:$0xff]  ;;  %v666_v44 = vld [vmem:[%s3657_s14 + $0x30] sm:$0xff] }
  0x70   : > { %988 = vmatpush.bf16.msra.mxu1 %v2987_v5  ;;  %v664_v39 = vld [vmem:[%s3657_s14 + $0x20] sm:$0xff]  ;;  %v729_v40 = vmul.f32 %v3717_v14, %v696_v35  ;;  %v731_v41 = vmul.f32 %v3717_v14, %v698_v36  ;;  %v730_v42 = vmul.f32 %v3717_v14, %v697_v37  ;;  %v732_v43 = vmul.f32 %v3717_v14, %v699_v38  ;;  %v665_v45 = vld [vmem:[%s3657_s14 + $0x28] sm:$0xff]  ;;  %v667_v46 = vld [vmem:[%s3657_s14 + $0x38] sm:$0xff] }
  0x71   : > { %v789_v33 = vpack.c.bf16 %v759_v28, %v757_v27  ;;  %v790_v34 = vpack.c.bf16 %v760_v30, %v758_v29  ;;  %v700_v53 = vld [vmem:[%s3665_s18 + $0x40] sm:$0xff]  ;;  %v702_v54 = vld [vmem:[%s3665_s18 + $0x50] sm:$0xff]  ;;  %v701_v55 = vld [vmem:[%s3665_s18 + $0x48] sm:$0xff] }
  0x72   : > { %v761_v47 = vadd.f32 %v729_v40, %v664_v39  ;;  %v763_v48 = vadd.f32 %v731_v41, %v666_v44  ;;  %v762_v49 = vadd.f32 %v730_v42, %v665_v45  ;;  %v764_v50 = vadd.f32 %v732_v43, %v667_v46  ;;  %v703_v56 = vld [vmem:[%s3665_s18 + $0x58] sm:$0xff]  ;;  %v668_v57 = vld [vmem:[%s3657_s14 + $0x40] sm:$0xff]  ;;  %v670_v62 = vld [vmem:[%s3657_s14 + $0x50] sm:$0xff] }
  0x73   : > { %940 = vmatpush.bf16.msra.mxu0 %v2978_v6  ;;  %v733_v58 = vmul.f32 %v3717_v14, %v700_v53  ;;  %v735_v59 = vmul.f32 %v3717_v14, %v702_v54  ;;  %v734_v60 = vmul.f32 %v3717_v14, %v701_v55  ;;  %v736_v61 = vmul.f32 %v3717_v14, %v703_v56  ;;  %v669_v63 = vld [vmem:[%s3657_s14 + $0x48] sm:$0xff]  ;;  %v671_v0 = vld [vmem:[%s3657_s14 + $0x58] sm:$0xff]  ;;  %v708_v26 = vld [vmem:[%s3665_s18 + $0x80] sm:$0xff] }
  0x74   : > { %989 = vmatpush.bf16.msra.mxu1 %v2986_v7  ;;  %v791_v51 = vpack.c.bf16 %v763_v48, %v761_v47  ;;  %v792_v52 = vpack.c.bf16 %v764_v50, %v762_v49  ;;  %v704_v7 = vld [vmem:[%s3665_s18 + $0x60] sm:$0xff]  ;;  %v675_v19 = vld [vmem:[%s3657_s14 + $0x78] sm:$0xff]  ;;  %v710_v27 = vld [vmem:[%s3665_s18 + $0x90] sm:$0xff] }
  0x75   : > { %v765_v1 = vadd.f32 %v733_v58, %v668_v57  ;;  %v767_v2 = vadd.f32 %v735_v59, %v670_v62  ;;  %v766_v3 = vadd.f32 %v734_v60, %v669_v63  ;;  %v768_v4 = vadd.f32 %v736_v61, %v671_v0  ;;  %v709_v28 = vld [vmem:[%s3665_s18 + $0x88] sm:$0xff]  ;;  %v711_v29 = vld [vmem:[%s3665_s18 + $0x98] sm:$0xff]  ;;  %v676_v30 = vld [vmem:[%s3657_s14 + $0x80] sm:$0xff] }
  0x76   : > { %v737_v12 = vmul.f32 %v3717_v14, %v704_v7  ;;  %v678_v35 = vld [vmem:[%s3657_s14 + $0x90] sm:$0xff]  ;;  %v677_v36 = vld [vmem:[%s3657_s14 + $0x88] sm:$0xff]  ;;  %v679_v37 = vld [vmem:[%s3657_s14 + $0x98] sm:$0xff] }
  0x77   : > { %941 = vmatpush.bf16.msra.mxu0 %v2977_v8  ;;  %v793_v5 = vpack.c.bf16 %v767_v2, %v765_v1  ;;  %v794_v6 = vpack.c.bf16 %v768_v4, %v766_v3  ;;  %v706_v8 = vld [vmem:[%s3665_s18 + $0x70] sm:$0xff]  ;;  %v712_v44 = vld [vmem:[%s3665_s18 + $0xa0] sm:$0xff]  ;;  %v2997_v45 = vld [vmem:[%s4696_s6 + $0x38] sm:$0xff] }
  0x78   : > { %990 = vmatpush.bf16.msra.mxu1 %v2985_v9  ;;  %v705_v9 = vld [vmem:[%s3665_s18 + $0x68] sm:$0xff]  ;;  %v739_v13 = vmul.f32 %v3717_v14, %v706_v8  ;;  %v714_v46 = vld [vmem:[%s3665_s18 + $0xb0] sm:$0xff]  ;;  %v715_v48 = vld [vmem:[%s3665_s18 + $0xb8] sm:$0xff]  ;;  %1127 = vmatpush.bf16.msra.mxu2 %v2997_v45  ;;  %v745_v50 = vmul.f32 %v3717_v14, %v712_v44 }
  0x79   : > { %v738_v15 = vmul.f32 %v3717_v14, %v705_v9  ;;  %v713_v47 = vld [vmem:[%s3665_s18 + $0xa8] sm:$0xff]  ;;  %v680_v49 = vld [vmem:[%s3657_s14 + $0xa0] sm:$0xff]  ;;  %v748_v53 = vmul.f32 %v3717_v14, %v715_v48  ;;  %v682_v54 = vld [vmem:[%s3657_s14 + $0xb0] sm:$0xff] }
  0x7a   : > { %v681_v55 = vld [vmem:[%s3657_s14 + $0xa8] sm:$0xff]  ;;  %v683_v56 = vld [vmem:[%s3657_s14 + $0xb8] sm:$0xff]  ;;  %v777_v57 = vadd.f32 %v745_v50, %v680_v49  ;;  %v716_v63 = vld [vmem:[%s3665_s18 + $0xc0] sm:$0xff] }
  0x7b   : > { %942 = vmatpush.bf16.msra.mxu0 %v2976_v10  ;;  %v707_v10 = vld [vmem:[%s3665_s18 + $0x78] sm:$0xff]  ;;  %v780_v60 = vadd.f32 %v748_v53, %v683_v56  ;;  %v2996_v0 = vld [vmem:[%s4696_s6 + $0x30] sm:$0xff]  ;;  %v717_v2 = vld [vmem:[%s3665_s18 + $0xc8] sm:$0xff] }
  0x7c   : > { %991 = vmatpush.bf16.msra.mxu1 %v2984_v11  ;;  %v672_v11 = vld [vmem:[%s3657_s14 + $0x60] sm:$0xff]  ;;  %v740_v16 = vmul.f32 %v3717_v14, %v707_v10  ;;  %v718_v1 = vld [vmem:[%s3665_s18 + $0xd0] sm:$0xff]  ;;  %v719_v3 = vld [vmem:[%s3665_s18 + $0xd8] sm:$0xff]  ;;  %1128 = vmatpush.bf16.msra.mxu2 %v2996_v0  ;;  %v750_v8 = vmul.f32 %v3717_v14, %v717_v2 }
  0x7d   : > { %v769_v20 = vadd.f32 %v737_v12, %v672_v11  ;;  %v2995_v4 = vld [vmem:[%s4696_s6 + $0x28] sm:$0xff]  ;;  %v751_v7 = vmul.f32 %v3717_v14, %v718_v1  ;;  %v752_v9 = vmul.f32 %v3717_v14, %v719_v3  ;;  %v686_v10 = vld [vmem:[%s3657_s14 + $0xd0] sm:$0xff]  ;;  %v687_v12 = vld [vmem:[%s3657_s14 + $0xd8] sm:$0xff] }
  0x7e   : > { %v772_v23 = vadd.f32 %v740_v16, %v675_v19  ;;  %v685_v11 = vld [vmem:[%s3657_s14 + $0xc8] sm:$0xff]  ;;  %v3852_v44 = vld [vmem:[%s4695_s5] ss:$0 sm:$0xff] }
  0x7f   : > { %943 = vmatpush.bf16.msra.mxu0 %v2975_v17  ;;  %v674_v17 = vld [vmem:[%s3657_s14 + $0x70] sm:$0xff]  ;;  %v783_v16 = vadd.f32 %v751_v7, %v686_v10 }
  0x80   : > { %992 = vmatpush.bf16.msra.mxu1 %v2983_v18  ;;  %v673_v18 = vld [vmem:[%s3657_s14 + $0x68] sm:$0xff]  ;;  %v771_v21 = vadd.f32 %v739_v13, %v674_v17  ;;  %1129 = vmatpush.bf16.msra.mxu2 %v2995_v4  ;;  %v2994_v13 = vld [vmem:[%s4696_s6 + $0x20] sm:$0xff]  ;;  %v782_v17 = vadd.f32 %v750_v8, %v685_v11 }
  0x81   : > { %v770_v22 = vadd.f32 %v738_v15, %v673_v18  ;;  %v784_v18 = vadd.f32 %v752_v9, %v687_v12 }
  0x82   : > { %v795_v24 = vpack.c.bf16 %v771_v21, %v769_v20  ;;  %v2993_v21 = vld [vmem:[%s4696_s6 + $0x18] sm:$0xff] }
  0x83   : > { %944 = vmatpush.bf16.msra.mxu0 %v2974_v31  ;;  %v796_v25 = vpack.c.bf16 %v772_v23, %v770_v22  ;;  %v741_v31 = vmul.f32 %v3717_v14, %v708_v26  ;;  %v802_v20 = vpack.c.bf16 %v784_v18, %v782_v17  ;;  %v720_v22 = vld [vmem:[%s3665_s18 + $0xe0] sm:$0xff]  ;;  %v722_v23 = vld [vmem:[%s3665_s18 + $0xf0] sm:$0xff] }
  0x84   : > { %993 = vmatpush.bf16.msra.mxu1 %v2982_v32  ;;  %v743_v32 = vmul.f32 %v3717_v14, %v710_v27  ;;  %1130 = vmatpush.bf16.msra.mxu2 %v2994_v13  ;;  %v2992_v26 = vld [vmem:[%s4696_s6 + $0x10] sm:$0xff]  ;;  %v688_v27 = vld [vmem:[%s3657_s14 + $0xe0] sm:$0xff] }
  0x85   : > { %v773_v38 = vadd.f32 %v741_v31, %v676_v30  ;;  %v755_v30 = vmul.f32 %v3717_v14, %v722_v23 }
  0x86   : > { %945 = vmatmul.bf16.vlgmr.msra.gmra.mxu0 %v789_v33  ;;  %v742_v33 = vmul.f32 %v3717_v14, %v709_v28  ;;  %v775_v39 = vadd.f32 %v743_v32, %v678_v35  ;;  %v690_v28 = vld [vmem:[%s3657_s14 + $0xf0] sm:$0xff]  ;;  %v2991_v35 = vld [vmem:[%s4696_s6 + $0x8] sm:$0xff] }
  0x87   : > { %994 = vmatmul.bf16.vlgmr.msra.gmra.mxu1 %v790_v34  ;;  %v744_v34 = vmul.f32 %v3717_v14, %v711_v29  ;;  %v753_v29 = vmul.f32 %v3717_v14, %v720_v22 }
  0x88   : > { %v774_v40 = vadd.f32 %v742_v33, %v677_v36  ;;  %v797_v42 = vpack.c.bf16 %v775_v39, %v773_v38  ;;  %1131 = vmatpush.bf16.msra.mxu2 %v2993_v21  ;;  %v689_v33 = vld [vmem:[%s3657_s14 + $0xe8] sm:$0xff] }
  0x89   : > { %v776_v41 = vadd.f32 %v744_v34, %v679_v37  ;;  %v691_v34 = vld [vmem:[%s3657_s14 + $0xf8] sm:$0xff]  ;;  %v785_v36 = vadd.f32 %v753_v29, %v688_v27  ;;  %v787_v37 = vadd.f32 %v755_v30, %v690_v28 }
  0x8b   : > { %v798_v43 = vpack.c.bf16 %v776_v41, %v774_v40  ;;  %v2990_v40 = vld [vmem:[%s4696_s6] sm:$0xff]  ;;  %v803_v41 = vpack.c.bf16 %v787_v37, %v785_v36 }
  0x8c   : > { %1132 = vmatpush.bf16.msra.mxu2 %v2992_v26 }
  0x90   : > { %1133 = vmatpush.bf16.msra.mxu2 %v2991_v35 }
  0x94   : > { %1134 = vmatpush.bf16.msra.mxu2 %v2990_v40 }
  0x96   : > { %950 = vmatmul.bf16.gmra.mxu0 %v791_v51  ;;  %v747_v51 = vmul.f32 %v3717_v14, %v714_v46 }
  0x97   : > { %999 = vmatmul.bf16.gmra.mxu1 %v792_v52  ;;  %v746_v52 = vmul.f32 %v3717_v14, %v713_v47 }
  0x98   : > { %v779_v58 = vadd.f32 %v747_v51, %v682_v54 }
  0x99   : > { %v778_v59 = vadd.f32 %v746_v52, %v681_v55 }
  0x9a   : > { %v799_v61 = vpack.c.bf16 %v779_v58, %v777_v57 }
  0x9b   : > { %v800_v62 = vpack.c.bf16 %v780_v60, %v778_v59 }
  0xa6   : > { %955 = vmatmul.bf16.gmra.mxu0 %v793_v5  ;;  %v684_v5 = vld [vmem:[%s3657_s14 + $0xc0] sm:$0xff] }
  0xa7   : > { %1004 = vmatmul.bf16.gmra.mxu1 %v794_v6  ;;  %v749_v6 = vmul.f32 %v3717_v14, %v716_v63 }
  0xa9   : > { %v781_v15 = vadd.f32 %v749_v6, %v684_v5 }
  0xab   : > { %v801_v19 = vpack.c.bf16 %v783_v16, %v781_v15 }
  0xb6   : > { %960 = vmatmul.bf16.gmra.mxu0 %v795_v24  ;;  %v721_v24 = vld [vmem:[%s3665_s18 + $0xe8] sm:$0xff] }
  0xb7   : > { %1009 = vmatmul.bf16.gmra.mxu1 %v796_v25  ;;  %v723_v25 = vld [vmem:[%s3665_s18 + $0xf8] sm:$0xff]  ;;  %v754_v31 = vmul.f32 %v3717_v14, %v721_v24  ;;  %s2477_s18 = scalar_lea.sflag [#allocation6], %s3650_s11 }
  0xb8   : > { %v756_v32 = vmul.f32 %v3717_v14, %v723_v25 }
  0xb9   : > { %v786_v38 = vadd.f32 %v754_v31, %v689_v33 }
  0xba   : > { %v788_v39 = vadd.f32 %v756_v32, %v691_v34 }
  0xc6   : > { %965 = vmatmul.bf16.gmra.mxu0 %v797_v42  ;;  %v804_v42 = vpack.c.bf16 %v788_v39, %v786_v38 }
  0xc7   : > { %1014 = vmatmul.bf16.gmra.mxu1 %v798_v43 }
  0xd6   : > { %970 = vmatmul.bf16.gmra.mxu0 %v799_v61 }
  0xd7   : > { %1019 = vmatmul.bf16.gmra.mxu1 %v800_v62 }
  0xe6   : > { %975 = vmatmul.bf16.gmra.mxu0 %v801_v19 }
  0xe7   : > { %1024 = vmatmul.bf16.gmra.mxu1 %v802_v20 }
  0xf6   : > { %980 = vmatmul.bf16.gmra.mxu0 %v803_v41 }
  0xf7   : > { %1029 = vmatmul.bf16.gmra.mxu1 %v804_v42 }
 0x103   : > { %v946_v14 = vpop.f32.mrf.mxu0 }
 0x104   : > { %v995_v43 = vpop.f32.mrf.mxu1  ;;  %v947_v45 = vadd.f32 %v3852_v44, %v946_v14 }
 0x106   : > { %v996_v48 = vadd.f32 %v995_v43, %v947_v45 }
 0x108   : > { %v1035_v51 = vmax.f32 %v996_v48, 0.0  ;;  %v3005_v48 = vld [vmem:[%s4698_s8 + $0x38] sm:$0xff] }
 0x109   : > { %1268 = vmatpush.bf16.msra.mxu3 %v3005_v48 }
 0x10b   : > { %v948_v46 = vpop.f32.mrf.mxu0 }
 0x10c   : > { %v997_v47 = vpop.f32.mrf.mxu1  ;;  %v949_v49 = vadd.f32 %v3852_v44, %v948_v46 }
 0x10e   : > { %v998_v50 = vadd.f32 %v997_v47, %v949_v49  ;;  %v3004_v49 = vld [vmem:[%s4698_s8 + $0x30] sm:$0xff] }
 0x10f   : > { %1269 = vmatpush.bf16.msra.mxu3 %v3004_v49 }
 0x110   : > { %v1036_v52 = vmax.f32 %v998_v50, 0.0 }
 0x112   : > { %v1051_v53 = vpack.c.bf16 %v1036_v52, %v1035_v51  ;;  %v3003_v51 = vld [vmem:[%s4698_s8 + $0x28] sm:$0xff] }
 0x113   : > { %v951_v54 = vpop.f32.mrf.mxu0  ;;  %1270 = vmatpush.bf16.msra.mxu3 %v3003_v51 }
 0x114   : > { %v1000_v55 = vpop.f32.mrf.mxu1  ;;  %1135 = vmatmul.bf16.vlgmr.msra.gmra.mxu2 %v1051_v53  ;;  %v952_v56 = vadd.f32 %v3852_v44, %v951_v54 }
 0x116   : > { %v1001_v59 = vadd.f32 %v1000_v55, %v952_v56 }
 0x118   : > { %v1037_v62 = vmax.f32 %v1001_v59, 0.0 }
 0x11b   : > { %v953_v57 = vpop.f32.mrf.mxu0 }
 0x11c   : > { %v1002_v58 = vpop.f32.mrf.mxu1  ;;  %v954_v60 = vadd.f32 %v3852_v44, %v953_v57  ;;  %v3002_v57 = vld [vmem:[%s4698_s8 + $0x20] sm:$0xff] }
 0x11d   : > { %1271 = vmatpush.bf16.msra.mxu3 %v3002_v57 }
 0x11e   : > { %v1003_v61 = vadd.f32 %v1002_v58, %v954_v60 }
 0x120   : > { %v1038_v63 = vmax.f32 %v1003_v61, 0.0 }
 0x122   : > { %v1052_v0 = vpack.c.bf16 %v1038_v63, %v1037_v62  ;;  %v3001_v63 = vld [vmem:[%s4698_s8 + $0x18] sm:$0xff] }
 0x123   : > { %v956_v1 = vpop.f32.mrf.mxu0  ;;  %1272 = vmatpush.bf16.msra.mxu3 %v3001_v63 }
 0x124   : > { %v1005_v2 = vpop.f32.mrf.mxu1  ;;  %1140 = vmatmul.bf16.gmra.mxu2 %v1052_v0  ;;  %v957_v3 = vadd.f32 %v3852_v44, %v956_v1  ;;  %v3000_v1 = vld [vmem:[%s4698_s8 + $0x10] sm:$0xff] }
 0x126   : > { %v1006_v6 = vadd.f32 %v1005_v2, %v957_v3 }
 0x127   : > { %1273 = vmatpush.bf16.msra.mxu3 %v3000_v1 }
 0x128   : > { %v1039_v9 = vmax.f32 %v1006_v6, 0.0  ;;  %v2999_v6 = vld [vmem:[%s4698_s8 + $0x8] sm:$0xff] }
 0x12b   : > { %v958_v4 = vpop.f32.mrf.mxu0  ;;  %1274 = vmatpush.bf16.msra.mxu3 %v2999_v6  ;;  %v3900_v6 = vld [vmem:[%s4699_s9] ss:$0 sm:$0xff] }
 0x12c   : > { %v1007_v5 = vpop.f32.mrf.mxu1  ;;  %v959_v7 = vadd.f32 %v3852_v44, %v958_v4 }
 0x12e   : > { %v1008_v8 = vadd.f32 %v1007_v5, %v959_v7 }
 0x130   : > { %v1040_v10 = vmax.f32 %v1008_v8, 0.0 }
 0x132   : > { %v1053_v11 = vpack.c.bf16 %v1040_v10, %v1039_v9  ;;  %v2998_v10 = vld [vmem:[%s4698_s8] sm:$0xff] }
 0x133   : > { %v961_v12 = vpop.f32.mrf.mxu0  ;;  %1275 = vmatpush.bf16.msra.mxu3 %v2998_v10 }
 0x134   : > { %v1010_v13 = vpop.f32.mrf.mxu1  ;;  %1145 = vmatmul.bf16.gmra.mxu2 %v1053_v11  ;;  %v962_v15 = vadd.f32 %v3852_v44, %v961_v12 }
 0x136   : > { %v1011_v18 = vadd.f32 %v1010_v13, %v962_v15 }
 0x138   : > { %v1041_v21 = vmax.f32 %v1011_v18, 0.0 }
 0x13b   : > { %v963_v16 = vpop.f32.mrf.mxu0 }
 0x13c   : > { %v1012_v17 = vpop.f32.mrf.mxu1  ;;  %v964_v19 = vadd.f32 %v3852_v44, %v963_v16 }
 0x13e   : > { %v1013_v20 = vadd.f32 %v1012_v17, %v964_v19 }
 0x140   : > { %v1042_v22 = vmax.f32 %v1013_v20, 0.0 }
 0x142   : > { %v1054_v23 = vpack.c.bf16 %v1042_v22, %v1041_v21 }
 0x143   : > { %v966_v24 = vpop.f32.mrf.mxu0 }
 0x144   : > { %v1015_v25 = vpop.f32.mrf.mxu1  ;;  %1150 = vmatmul.bf16.gmra.mxu2 %v1054_v23  ;;  %v967_v26 = vadd.f32 %v3852_v44, %v966_v24 }
 0x146   : > { %v1016_v29 = vadd.f32 %v1015_v25, %v967_v26 }
 0x148   : > { %v1043_v32 = vmax.f32 %v1016_v29, 0.0 }
 0x14b   : > { %v968_v27 = vpop.f32.mrf.mxu0 }
 0x14c   : > { %v1017_v28 = vpop.f32.mrf.mxu1  ;;  %v969_v30 = vadd.f32 %v3852_v44, %v968_v27 }
 0x14e   : > { %v1018_v31 = vadd.f32 %v1017_v28, %v969_v30 }
 0x150   : > { %v1044_v33 = vmax.f32 %v1018_v31, 0.0 }
 0x152   : > { %v1055_v34 = vpack.c.bf16 %v1044_v33, %v1043_v32 }
 0x153   : > { %v971_v35 = vpop.f32.mrf.mxu0 }
 0x154   : > { %v1020_v36 = vpop.f32.mrf.mxu1  ;;  %1155 = vmatmul.bf16.gmra.mxu2 %v1055_v34  ;;  %v972_v37 = vadd.f32 %v3852_v44, %v971_v35 }
 0x156   : > { %v1021_v40 = vadd.f32 %v1020_v36, %v972_v37 }
 0x158   : > { %v1045_v14 = vmax.f32 %v1021_v40, 0.0 }
 0x15b   : > { %v973_v38 = vpop.f32.mrf.mxu0 }
 0x15c   : > { %v1022_v39 = vpop.f32.mrf.mxu1  ;;  %v974_v41 = vadd.f32 %v3852_v44, %v973_v38 }
 0x15e   : > { %v1023_v42 = vadd.f32 %v1022_v39, %v974_v41 }
 0x160   : > { %v1046_v43 = vmax.f32 %v1023_v42, 0.0 }
 0x162   : > { %v1056_v45 = vpack.c.bf16 %v1046_v43, %v1045_v14 }
 0x163   : > { %v976_v46 = vpop.f32.mrf.mxu0 }
 0x164   : > { %v1025_v47 = vpop.f32.mrf.mxu1  ;;  %1160 = vmatmul.bf16.gmra.mxu2 %v1056_v45  ;;  %v977_v50 = vadd.f32 %v3852_v44, %v976_v46 }
 0x166   : > { %v1026_v54 = vadd.f32 %v1025_v47, %v977_v50 }
 0x168   : > { %v1047_v58 = vmax.f32 %v1026_v54, 0.0 }
 0x16b   : > { %v978_v52 = vpop.f32.mrf.mxu0 }
 0x16c   : > { %v1027_v53 = vpop.f32.mrf.mxu1  ;;  %v979_v55 = vadd.f32 %v3852_v44, %v978_v52 }
 0x16e   : > { %v1028_v56 = vadd.f32 %v1027_v53, %v979_v55 }
 0x170   : > { %v1048_v59 = vmax.f32 %v1028_v56, 0.0 }
 0x172   : > { %v1057_v60 = vpack.c.bf16 %v1048_v59, %v1047_v58 }
 0x173   : > { %v981_v61 = vpop.f32.mrf.mxu0 }
 0x174   : > { %v1030_v62 = vpop.f32.mrf.mxu1  ;;  %1165 = vmatmul.bf16.gmra.mxu2 %v1057_v60  ;;  %v982_v0 = vadd.f32 %v3852_v44, %v981_v61 }
 0x176   : > { %v1031_v3 = vadd.f32 %v1030_v62, %v982_v0 }
 0x178   : > { %v1049_v8 = vmax.f32 %v1031_v3, 0.0 }
 0x17b   : > { %v983_v2 = vpop.f32.mrf.mxu0 }
 0x17c   : > { %v984_v4 = vadd.f32 %v3852_v44, %v983_v2  ;;  %v1032_v5 = vpop.f32.mrf.mxu1  ;;  %v3124_v44 = vld [vmem:[%s4697_s7] ss:$0 sm:$0xff] }
 0x17e   : > { %v1033_v7 = vadd.f32 %v1032_v5, %v984_v4  ;;  %v3009_v5 = vld [vmem:[#allocation9 + $0x18] sm:$0xff] }
 0x17f   : > { %1550 = vmatpush.bf16.msrb.mxu0 %v3009_v5 }
 0x180   : > { %v1050_v9 = vmax.f32 %v1033_v7, 0.0 }
 0x182   : > { %v1058_v11 = vpack.c.bf16 %v1050_v9, %v1049_v8 }
 0x184   : > { %1170 = vmatmul.bf16.gmra.mxu2 %v1058_v11 }
 0x197   : > { %v1136_v12 = vpop.f32.mrf.mxu2 }
 0x198   : > { %v1137_v13 = vadd.f32 %v3124_v44, %v1136_v12 }
 0x19a   : > { %v1176_v17 = vmax.f32 %v1137_v13, 0.0 }
 0x19f   : > { %v1138_v15 = vpop.f32.mrf.mxu2 }
 0x1a0   : > { %v1139_v16 = vadd.f32 %v3124_v44, %v1138_v15 }
 0x1a2   : > { %v1177_v18 = vmax.f32 %v1139_v16, 0.0  ;;  %v3008_v16 = vld [vmem:[#allocation9 + $0x10] sm:$0xff] }
 0x1a3   : > { %1551 = vmatpush.bf16.msrb.mxu0 %v3008_v16 }
 0x1a4   : > { %v1192_v19 = vpack.c.bf16 %v1177_v18, %v1176_v17 }
 0x1a6   : > { %1276 = vmatmul.bf16.vlgmr.msra.gmra.mxu3 %v1192_v19 }
 0x1a7   : > { %v1141_v20 = vpop.f32.mrf.mxu2 }
 0x1a8   : > { %v1142_v21 = vadd.f32 %v3124_v44, %v1141_v20 }
 0x1aa   : > { %v1178_v24 = vmax.f32 %v1142_v21, 0.0 }
 0x1af   : > { %v1143_v22 = vpop.f32.mrf.mxu2 }
 0x1b0   : > { %v1144_v23 = vadd.f32 %v3124_v44, %v1143_v22 }
 0x1b2   : > { %v1179_v25 = vmax.f32 %v1144_v23, 0.0 }
 0x1b4   : > { %v1193_v26 = vpack.c.bf16 %v1179_v25, %v1178_v24 }
 0x1b6   : > { %1281 = vmatmul.bf16.gmra.mxu3 %v1193_v26 }
 0x1b7   : > { %v1146_v27 = vpop.f32.mrf.mxu2 }
 0x1b8   : > { %v1147_v28 = vadd.f32 %v3124_v44, %v1146_v27 }
 0x1ba   : > { %v1180_v31 = vmax.f32 %v1147_v28, 0.0 }
 0x1bf   : > { %v1148_v29 = vpop.f32.mrf.mxu2 }
 0x1c0   : > { %v1149_v30 = vadd.f32 %v3124_v44, %v1148_v29 }
 0x1c2   : > { %v1181_v32 = vmax.f32 %v1149_v30, 0.0 }
 0x1c4   : > { %v1194_v33 = vpack.c.bf16 %v1181_v32, %v1180_v31 }
 0x1c6   : > { %1286 = vmatmul.bf16.gmra.mxu3 %v1194_v33 }
 0x1c7   : > { %v1151_v34 = vpop.f32.mrf.mxu2 }
 0x1c8   : > { %v1152_v35 = vadd.f32 %v3124_v44, %v1151_v34 }
 0x1ca   : > { %v1182_v38 = vmax.f32 %v1152_v35, 0.0 }
 0x1cf   : > { %v1153_v36 = vpop.f32.mrf.mxu2 }
 0x1d0   : > { %v1154_v37 = vadd.f32 %v3124_v44, %v1153_v36 }
 0x1d2   : > { %v1183_v39 = vmax.f32 %v1154_v37, 0.0  ;;  %v3007_v37 = vld [vmem:[#allocation9 + $0x8] sm:$0xff] }
 0x1d3   : > { %1552 = vmatpush.bf16.msrb.mxu0 %v3007_v37 }
 0x1d4   : > { %v1195_v40 = vpack.c.bf16 %v1183_v39, %v1182_v38 }
 0x1d6   : > { %1291 = vmatmul.bf16.gmra.mxu3 %v1195_v40 }
 0x1d7   : > { %v1156_v41 = vpop.f32.mrf.mxu2 }
 0x1d8   : > { %v1157_v42 = vadd.f32 %v3124_v44, %v1156_v41 }
 0x1da   : > { %v1184_v45 = vmax.f32 %v1157_v42, 0.0 }
 0x1df   : > { %v1158_v14 = vpop.f32.mrf.mxu2 }
 0x1e0   : > { %v1159_v43 = vadd.f32 %v3124_v44, %v1158_v14 }
 0x1e2   : > { %v1185_v46 = vmax.f32 %v1159_v43, 0.0 }
 0x1e4   : > { %v1196_v47 = vpack.c.bf16 %v1185_v46, %v1184_v45 }
 0x1e6   : > { %1296 = vmatmul.bf16.gmra.mxu3 %v1196_v47 }
 0x1e7   : > { %v1161_v48 = vpop.f32.mrf.mxu2 }
 0x1e8   : > { %v1162_v49 = vadd.f32 %v3124_v44, %v1161_v48 }
 0x1ea   : > { %v1186_v52 = vmax.f32 %v1162_v49, 0.0 }
 0x1ef   : > { %v1163_v50 = vpop.f32.mrf.mxu2 }
 0x1f0   : > { %v1164_v51 = vadd.f32 %v3124_v44, %v1163_v50 }
 0x1f2   : > { %v1187_v53 = vmax.f32 %v1164_v51, 0.0 }
 0x1f4   : > { %v1197_v54 = vpack.c.bf16 %v1187_v53, %v1186_v52 }
 0x1f6   : > { %1301 = vmatmul.bf16.gmra.mxu3 %v1197_v54 }
 0x1f7   : > { %v1166_v55 = vpop.f32.mrf.mxu2 }
 0x1f8   : > { %v1167_v56 = vadd.f32 %v3124_v44, %v1166_v55 }
 0x1fa   : > { %v1188_v59 = vmax.f32 %v1167_v56, 0.0 }
 0x1ff   : > { %v1168_v57 = vpop.f32.mrf.mxu2 }
 0x200   : > { %v1169_v58 = vadd.f32 %v3124_v44, %v1168_v57 }
 0x202   : > { %v1189_v60 = vmax.f32 %v1169_v58, 0.0  ;;  %v3006_v58 = vld [vmem:[#allocation9] sm:$0xff] }
 0x203   : > { %1553 = vmatpush.bf16.msrb.mxu0 %v3006_v58 }
 0x204   : > { %v1198_v61 = vpack.c.bf16 %v1189_v60, %v1188_v59 }
 0x206   : > { %1306 = vmatmul.bf16.gmra.mxu3 %v1198_v61 }
 0x207   : > { %v1171_v62 = vpop.f32.mrf.mxu2 }
 0x208   : > { %v1172_v63 = vadd.f32 %v3124_v44, %v1171_v62 }
 0x20a   : > { %v1190_v2 = vmax.f32 %v1172_v63, 0.0 }
 0x20f   : > { %v1173_v0 = vpop.f32.mrf.mxu2 }
 0x210   : > { %v1174_v1 = vadd.f32 %v3124_v44, %v1173_v0 }
 0x212   : > { %v1191_v3 = vmax.f32 %v1174_v1, 0.0 }
 0x214   : > { %v1199_v4 = vpack.c.bf16 %v1191_v3, %v1190_v2 }
 0x216   : > { %1311 = vmatmul.bf16.gmra.mxu3 %v1199_v4 }
 0x229   : > { %v1277_v7 = vpop.f32.mrf.mxu3 }
 0x22a   : > { %v3903_v8 = vadd.f32 %v3900_v6, %v1277_v7 }
 0x22c   : > { %v3906_v9 = vmul.f32 0.5, %v3903_v8 }
 0x22e   : > { %v1333_v10 = vmul.f32 1.442695, %v3906_v9 }
 0x230   : > { %3128 = vpow2.f32 %v1333_v10 }
 0x231   : > { %v1279_v11 = vpop.f32.mrf.mxu3 }
 0x232   : > { %v3910_v12 = vadd.f32 %v3900_v6, %v1279_v11 }
 0x234   : > { %v3913_v44 = vmul.f32 0.5, %v3910_v12  ;;  %v2041_v58 = vmul.f32 %v3910_v12, %v3910_v12 }
 0x236   : > { %v3915_v13 = vpop.eup %3128  ;;  %v1335_v15 = vmul.f32 1.442695, %v3913_v44 }
 0x237   : > { %1397 = vrot.lane.b32.xlu0 %v3915_v13, %s3430_s29 }
 0x238   : > { %3130 = vpow2.f32 %v1335_v15 }
 0x239   : > { %v1282_v17 = vpop.f32.mrf.mxu3 }
 0x23a   : > { %v3921_v18 = vadd.f32 %v3900_v6, %v1282_v17 }
 0x23c   : > { %v3924_v19 = vmul.f32 0.5, %v3921_v18 }
 0x23e   : > { %v3926_v20 = vpop.eup %3130  ;;  %v1337_v21 = vmul.f32 1.442695, %v3924_v19 }
 0x23f   : > { %1399 = vrot.lane.b32.xlu0 %v3926_v20, %s3430_s29 }
 0x240   : > { %3132 = vpow2.f32 %v1337_v21 }
 0x241   : > { %v1284_v22 = vpop.f32.mrf.mxu3 }
 0x242   : > { %v3932_v23 = vadd.f32 %v3900_v6, %v1284_v22 }
 0x244   : > { %v3935_v24 = vmul.f32 0.5, %v3932_v23 }
 0x246   : > { %v3937_v25 = vpop.eup %3132  ;;  %v1339_v26 = vmul.f32 1.442695, %v3935_v24 }
 0x247   : > { %1401 = vrot.lane.b32.xlu1 %v3937_v25, %s3430_s29 }
 0x248   : > { %3134 = vpow2.f32 %v1339_v26 }
 0x249   : > { %v1287_v27 = vpop.f32.mrf.mxu3 }
 0x24a   : > { %v3943_v28 = vadd.f32 %v3900_v6, %v1287_v27 }
 0x24c   : > { %v3946_v29 = vmul.f32 0.5, %v3943_v28 }
 0x24e   : > { %v3948_v30 = vpop.eup %3134  ;;  %v1341_v31 = vmul.f32 1.442695, %v3946_v29 }
 0x24f   : > { %1403 = vrot.lane.b32.xlu1 %v3948_v30, %s3430_s29 }
 0x250   : > { %3136 = vpow2.f32 %v1341_v31 }
 0x251   : > { %v1289_v32 = vpop.f32.mrf.mxu3 }
 0x252   : > { %v3954_v33 = vadd.f32 %v3900_v6, %v1289_v32 }
 0x254   : > { %v3957_v34 = vmul.f32 0.5, %v3954_v33 }
 0x256   : > { %v3959_v35 = vpop.eup %3136  ;;  %v1343_v36 = vmul.f32 1.442695, %v3957_v34 }
 0x257   : > { %1405 = vrot.lane.b32.xlu2 %v3959_v35, %s3430_s29 }
 0x258   : > { %3138 = vpow2.f32 %v1343_v36 }
 0x259   : > { %v1292_v38 = vpop.f32.mrf.mxu3 }
 0x25a   : > { %v3965_v39 = vadd.f32 %v3900_v6, %v1292_v38 }
 0x25c   : > { %v3968_v40 = vmul.f32 0.5, %v3965_v39 }
 0x25e   : > { %v3970_v41 = vpop.eup %3138  ;;  %v1345_v42 = vmul.f32 1.442695, %v3968_v40 }
 0x25f   : > { %1407 = vrot.lane.b32.xlu2 %v3970_v41, %s3430_s29 }
 0x260   : > { %3140 = vpow2.f32 %v1345_v42 }
 0x261   : > { %v1294_v14 = vpop.f32.mrf.mxu3 }
 0x262   : > { %v3976_v43 = vadd.f32 %v3900_v6, %v1294_v14 }
 0x264   : > { %v3979_v45 = vmul.f32 0.5, %v3976_v43 }
 0x266   : > { %v3981_v46 = vpop.eup %3140  ;;  %v1347_v47 = vmul.f32 1.442695, %v3979_v45 }
 0x267   : > { %1409 = vrot.lane.b32.xlu0 %v3981_v46, %s3430_s29 }
 0x268   : > { %3142 = vpow2.f32 %v1347_v47  ;;  %v3017_v47 = vld [vmem:[#allocation10 + $0x38] sm:$0xff] }
 0x269   : > { %v1297_v48 = vpop.f32.mrf.mxu3  ;;  %1687 = vmatpush.bf16.msrb.mxu1 %v3017_v47 }
 0x26a   : > { %v3987_v49 = vadd.f32 %v3900_v6, %v1297_v48  ;;  %v2040_v48 = vmul.f32 %v3903_v8, %v3903_v8 }
 0x26c   : > { %v3990_v50 = vmul.f32 0.5, %v3987_v49 }
 0x26e   : > { %v3992_v51 = vpop.eup %3142  ;;  %v1349_v52 = vmul.f32 1.442695, %v3990_v50 }
 0x26f   : > { %1411 = vrot.lane.b32.xlu1 %v3992_v51, %s3430_s29 }
 0x270   : > { %3144 = vpow2.f32 %v1349_v52 }
 0x271   : > { %v1299_v53 = vpop.f32.mrf.mxu3 }
 0x272   : > { %v3998_v54 = vadd.f32 %v3900_v6, %v1299_v53 }
 0x274   : > { %v4001_v55 = vmul.f32 0.5, %v3998_v54 }
 0x276   : > { %v4003_v56 = vpop.eup %3144  ;;  %v1351_v57 = vmul.f32 1.442695, %v4001_v55 }
 0x277   : > { %1413 = vrot.lane.b32.xlu2 %v4003_v56, %s3430_s29 }
 0x278   : > { %3146 = vpow2.f32 %v1351_v57  ;;  %v1365_v57 = vld [vmem:[%s4081_s17] sm:$0xff] }
 0x279   : > { %v1302_v59 = vpop.f32.mrf.mxu3 }
 0x27a   : > { %v4009_v60 = vadd.f32 %v3900_v6, %v1302_v59  ;;  %v2043_v59 = vmul.f32 %v3932_v23, %v3932_v23 }
 0x27c   : > { %v4012_v61 = vmul.f32 0.5, %v4009_v60 }
 0x27e   : > { %v4014_v62 = vpop.eup %3146  ;;  %v1353_v63 = vmul.f32 1.442695, %v4012_v61 }
 0x27f   : > { %1415 = vrot.lane.b32.xlu0 %v4014_v62, %s3430_s29 }
 0x280   : > { %3148 = vpow2.f32 %v1353_v63 }
 0x281   : > { %v1304_v0 = vpop.f32.mrf.mxu3 }
 0x282   : > { %v4020_v1 = vadd.f32 %v3900_v6, %v1304_v0  ;;  %v1366_v0 = vld [vmem:[%s4081_s17 + $0x8] sm:$0xff] }
 0x284   : > { %v4023_v2 = vmul.f32 0.5, %v4020_v1 }
 0x286   : > { %v4025_v3 = vpop.eup %3148  ;;  %v1355_v4 = vmul.f32 1.442695, %v4023_v2 }
 0x287   : > { %1417 = vrot.lane.b32.xlu1 %v4025_v3, %s3430_s29 }
 0x288   : > { %3150 = vpow2.f32 %v1355_v4 }
 0x289   : > { %v1307_v5 = vpop.f32.mrf.mxu3 }
 0x28a   : > { %v4031_v7 = vadd.f32 %v3900_v6, %v1307_v5 }
 0x28c   : > { %v4034_v10 = vmul.f32 0.5, %v4031_v7 }
 0x28e   : > { %v4036_v11 = vpop.eup %3150  ;;  %v1357_v15 = vmul.f32 1.442695, %v4034_v10 }
 0x28f   : > { %1419 = vrot.lane.b32.xlu2 %v4036_v11, %s3430_s29 }
 0x290   : > { %3152 = vpow2.f32 %v1357_v15 }
 0x291   : > { %v1309_v16 = vpop.f32.mrf.mxu3 }
 0x292   : > { %v4042_v17 = vadd.f32 %v3900_v6, %v1309_v16 }
 0x294   : > { %v4045_v21 = vmul.f32 0.5, %v4042_v17 }
 0x296   : > { %v4047_v22 = vpop.eup %3152  ;;  %v1359_v26 = vmul.f32 1.442695, %v4045_v21 }
 0x297   : > { %1421 = vrot.lane.b32.xlu0 %v4047_v22, %s3430_s29 }
 0x298   : > { %3154 = vpow2.f32 %v1359_v26 }
 0x299   : > { %v1312_v27 = vpop.f32.mrf.mxu3 }
 0x29a   : > { %v4053_v31 = vadd.f32 %v3900_v6, %v1312_v27  ;;  %v3016_v27 = vld [vmem:[#allocation10 + $0x30] sm:$0xff] }
 0x29b   : > { %1688 = vmatpush.bf16.msrb.mxu1 %v3016_v27  ;;  %v2050_v27 = vmul.f32 %v4009_v60, %v4009_v60 }
 0x29c   : > { %v4056_v32 = vmul.f32 0.5, %v4053_v31 }
 0x29e   : > { %v4059_v36 = vpop.eup %3154  ;;  %v1361_v37 = vmul.f32 1.442695, %v4056_v32 }
 0x29f   : > { %1423 = vrot.lane.b32.xlu1 %v4059_v36, %s3430_s29 }
 0x2a0   : > { %3156 = vpow2.f32 %v1361_v37  ;;  %v2044_v37 = vmul.f32 %v3943_v28, %v3943_v28 }
 0x2a1   : > { %v1314_v38 = vpop.f32.mrf.mxu3 }
 0x2a2   : > { %v4065_v42 = vadd.f32 %v3900_v6, %v1314_v38  ;;  %v2046_v38 = vmul.f32 %v3965_v39, %v3965_v39 }
 0x2a4   : > { %v4068_v14 = vmul.f32 0.5, %v4065_v42 }
 0x2a6   : > { %v4072_v52 = vpop.eup %3156  ;;  %v1363_v53 = vmul.f32 1.442695, %v4068_v14 }
 0x2a7   : > { %1425 = vrot.lane.b32.xlu2 %v4072_v52, %s3430_s29  ;;  %2072 = vrot.lane.b32.xlu1 %v2040_v48, %s3430_s29  ;;  %v2042_v48 = vmul.f32 %v3921_v18, %v3921_v18 }
 0x2a8   : > { %3158 = vpow2.f32 %v1363_v53  ;;  %v2047_v53 = vmul.f32 %v3976_v43, %v3976_v43 }
 0x2a9   : > { %v1398_v6 = vpop.permute.xlu0 %1397 }
 0x2aa   : > { %v1445_v4 = vmul.f32 %v1398_v6, %v1365_v57  ;;  %v2049_v6 = vmul.f32 %v3998_v54, %v3998_v54  ;;  %v2045_v57 = vmul.f32 %v3954_v33, %v3954_v33 }
 0x2ac   : > { %v1461_v16 = vadd.f32 %v1445_v4, %v3903_v8 }
 0x2ae   : > { %v4088_v63 = vpop.eup %3158 }
 0x2af   : > { %2074 = vrot.lane.b32.xlu2 %v2041_v58, %s3430_s29  ;;  %2078 = vrot.lane.b32.xlu1 %v2043_v59, %s3430_s29  ;;  %v1368_v58 = vld [vmem:[%s4081_s17 + $0x18] sm:$0xff] }
 0x2b0   : > { %1427 = vrot.lane.b32.xlu0 %v4088_v63, %s3430_s29 }
 0x2b1   : > { %v1400_v5 = vpop.permute.xlu0 %1399 }
 0x2b2   : > { %v1446_v15 = vmul.f32 %v1400_v5, %v1366_v0  ;;  %v1406_v0 = vpop.permute.xlu2 %1405 }
 0x2b4   : > { %v1462_v26 = vadd.f32 %v1446_v15, %v3910_v12  ;;  %v1367_v12 = vld [vmem:[%s4081_s17 + $0x10] sm:$0xff] }
 0x2b6   : > { %v1477_v47 = vpack.c.bf16 %v1462_v26, %v1461_v16  ;;  %v3015_v26 = vld [vmem:[#allocation10 + $0x28] sm:$0xff] }
 0x2b7   : > { %2080 = vrot.lane.b32.xlu2 %v2044_v37, %s3430_s29  ;;  %2084 = vrot.lane.b32.xlu1 %v2046_v38, %s3430_s29  ;;  %v2052_v37 = vmul.f32 %v4031_v7, %v4031_v7  ;;  %v2048_v38 = vmul.f32 %v3987_v49, %v3987_v49 }
 0x2b8   : > { %2076 = vrot.lane.b32.xlu0 %v2042_v48, %s3430_s29  ;;  %2841 = vmatmul.msk.bf16.vlgmr.msrb.gmra.mxu0 %vm1521_vm0, %v1477_v47  ;;  %v1369_v48 = vld [vmem:[%s4081_s17 + $0x20] sm:$0xff] }
 0x2b9   : > { %v1402_v8 = vpop.permute.xlu1 %1401  ;;  %1689 = vmatpush.bf16.msrb.mxu1 %v3015_v26  ;;  %v1372_v26 = vld [vmem:[%s4081_s17 + $0x38] sm:$0xff] }
 0x2ba   : > { %v1447_v59 = vmul.f32 %v1402_v8, %v1367_v12  ;;  %v2053_v8 = vmul.f32 %v4042_v17, %v4042_v17  ;;  %v2055_v12 = vmul.f32 %v4065_v42, %v4065_v42 }
 0x2bc   : > { %v1463_v15 = vadd.f32 %v1447_v59, %v3921_v18  ;;  %v1370_v18 = vld [vmem:[%s4081_s17 + $0x28] sm:$0xff] }
 0x2bf   : > { %2086 = vrot.lane.b32.xlu2 %v2047_v53, %s3430_s29  ;;  %2090 = vrot.lane.b32.xlu1 %v2049_v6, %s3430_s29  ;;  %v2051_v6 = vmul.f32 %v4020_v1, %v4020_v1 }
 0x2c0   : > { %2082 = vrot.lane.b32.xlu0 %v2045_v57, %s3430_s29  ;;  %v1449_v57 = vmul.f32 %v1406_v0, %v1369_v48 }
 0x2c1   : > { %v1404_v4 = vpop.permute.xlu1 %1403 }
 0x2c2   : > { %v1448_v5 = vmul.f32 %v1404_v4, %v1368_v58  ;;  %v1465_v59 = vadd.f32 %v1449_v57, %v3943_v28  ;;  %v2054_v4 = vmul.f32 %v4053_v31, %v4053_v31 }
 0x2c4   : > { %v1464_v16 = vadd.f32 %v1448_v5, %v3932_v23  ;;  %v1408_v23 = vpop.permute.xlu2 %1407 }
 0x2c5   : > { %v1450_v53 = vmul.f32 %v1408_v23, %v1370_v18  ;;  %v1373_v23 = vld [vmem:[%s4081_s17 + $0x40] sm:$0xff] }
 0x2c6   : > { %v1478_v47 = vpack.c.bf16 %v1464_v16, %v1463_v15  ;;  %v3014_v15 = vld [vmem:[#allocation10 + $0x20] sm:$0xff]  ;;  %v1371_v16 = vld [vmem:[%s4081_s17 + $0x30] sm:$0xff] }
 0x2c7   : > { %2092 = vrot.lane.b32.xlu2 %v2050_v27, %s3430_s29  ;;  %2096 = vrot.lane.b32.xlu1 %v2052_v37, %s3430_s29  ;;  %v1466_v58 = vadd.f32 %v1450_v53, %v3954_v33 }
 0x2c8   : > { %2088 = vrot.lane.b32.xlu0 %v2048_v38, %s3430_s29  ;;  %2842 = vmatmul.msk.bf16.gmra.mxu0 %vm1521_vm0, %v1478_v47  ;;  %v3013_v47 = vld [vmem:[#allocation10 + $0x18] sm:$0xff] }
 0x2c9   : > { %v1479_v5 = vpack.c.bf16 %v1466_v58, %v1465_v59  ;;  %1690 = vmatpush.bf16.msrb.mxu1 %v3014_v15  ;;  %v1376_v15 = vld [vmem:[%s4081_s17 + $0x58] sm:$0xff] }
 0x2cd   : > { %1691 = vmatpush.bf16.msrb.mxu1 %v3013_v47 }
 0x2cf   : > { %2098 = vrot.lane.b32.xlu2 %v2053_v8, %s3430_s29  ;;  %2102 = vrot.lane.b32.xlu1 %v2055_v12, %s3430_s29  ;;  %v1374_v8 = vld [vmem:[%s4081_s17 + $0x48] sm:$0xff] }
 0x2d0   : > { %2094 = vrot.lane.b32.xlu0 %v2051_v6, %s3430_s29 }
 0x2d1   : > { %v1414_v48 = vpop.permute.xlu2 %1413 }
 0x2d2   : > { %v1453_v12 = vmul.f32 %v1414_v48, %v1373_v23 }
 0x2d4   : > { %v1469_v57 = vadd.f32 %v1453_v12, %v3987_v49 }
 0x2d8   : > { %2100 = vrot.lane.b32.xlu0 %v2054_v4, %s3430_s29  ;;  %2843 = vmatmul.msk.bf16.gmra.mxu0 %vm1521_vm0, %v1479_v5  ;;  %v1375_v4 = vld [vmem:[%s4081_s17 + $0x50] sm:$0xff] }
 0x2d9   : > { %v1410_v0 = vpop.permute.xlu0 %1409 }
 0x2da   : > { %v1451_v27 = vmul.f32 %v1410_v0, %v1371_v16 }
 0x2dc   : > { %v1467_v28 = vadd.f32 %v1451_v27, %v3965_v39 }
 0x2e1   : > { %v1412_v37 = vpop.permute.xlu1 %1411 }
 0x2e2   : > { %v1452_v33 = vmul.f32 %v1412_v37, %v1372_v26 }
 0x2e4   : > { %v1468_v38 = vadd.f32 %v1452_v33, %v3976_v43  ;;  %v3012_v43 = vld [vmem:[#allocation10 + $0x10] sm:$0xff]  ;;  %v3011_v33 = vld [vmem:[#allocation10 + $0x8] sm:$0xff] }
 0x2e5   : > { %1692 = vmatpush.bf16.msrb.mxu1 %v3012_v43 }
 0x2e6   : > { %v1480_v18 = vpack.c.bf16 %v1468_v38, %v1467_v28 }
 0x2e8   : > { %2844 = vmatmul.msk.bf16.gmra.mxu0 %vm1521_vm0, %v1480_v18  ;;  %v1377_v18 = vld [vmem:[%s4081_s17 + $0x60] sm:$0xff] }
 0x2e9   : > { %v1420_v59 = vpop.permute.xlu2 %1419  ;;  %1693 = vmatpush.bf16.msrb.mxu1 %v3011_v33 }
 0x2ea   : > { %v1456_v0 = vmul.f32 %v1420_v59, %v1376_v15 }
 0x2ec   : > { %v1472_v49 = vadd.f32 %v1456_v0, %v4020_v1  ;;  %v2028_v1 = vmul.f32 %v3959_v35, %v3959_v35  ;;  %v2031_v35 = vmul.f32 %v3992_v51, %v3992_v51 }
 0x2f1   : > { %v1416_v53 = vpop.permute.xlu0 %1415 }
 0x2f2   : > { %v1454_v6 = vmul.f32 %v1416_v53, %v1374_v8  ;;  %v1378_v8 = vld [vmem:[%s4081_s17 + $0x68] sm:$0xff] }
 0x2f4   : > { %v1470_v58 = vadd.f32 %v1454_v6, %v3998_v54  ;;  %v2025_v54 = vmul.f32 %v3926_v20, %v3926_v20 }
 0x2f6   : > { %v1481_v39 = vpack.c.bf16 %v1470_v58, %v1469_v57 }
 0x2f8   : > { %2845 = vmatmul.msk.bf16.gmra.mxu0 %vm1521_vm0, %v1481_v39 }
 0x2f9   : > { %v1418_v5 = vpop.permute.xlu1 %1417 }
 0x2fa   : > { %v1455_v16 = vmul.f32 %v1418_v5, %v1375_v4  ;;  %v2024_v5 = vmul.f32 %v3915_v13, %v3915_v13  ;;  %v2034_v13 = vmul.f32 %v4025_v3, %v4025_v3 }
 0x2fc   : > { %v1471_v27 = vadd.f32 %v1455_v16, %v4009_v60 }
 0x2fe   : > { %v1482_v37 = vpack.c.bf16 %v1472_v49, %v1471_v27 }
 0x301   : > { %v1426_v26 = vpop.permute.xlu2 %1425 }
 0x308   : > { %2846 = vmatmul.msk.bf16.gmra.mxu0 %vm1521_vm0, %v1482_v37 }
 0x309   : > { %v2075_v28 = vpop.permute.xlu2 %2074  ;;  %v1422_v23 = vpop.permute.xlu0 %1421 }
 0x30a   : > { %v2121_v38 = vadd.f32 %v2075_v28, %v2025_v54  ;;  %v1457_v60 = vmul.f32 %v1422_v23, %v1377_v18  ;;  %v2027_v28 = vmul.f32 %v3948_v30, %v3948_v30 }
 0x30c   : > { %v2946_v47 = vadd.f32 -1.0, %v2121_v38  ;;  %v1473_v20 = vadd.f32 %v1457_v60, %v4031_v7  ;;  %v3010_v7 = vld [vmem:[#allocation10] sm:$0xff]  ;;  %v1380_v38 = vld [vmem:[%s4081_s17 + $0x78] sm:$0xff] }
 0x30d   : > { %1694 = vmatpush.bf16.msrb.mxu1 %v3010_v7 }
 0x30e   : > { %v2153_v48 = vmul.f32 0.5, %v2946_v47 }
 0x310   : > { %v2169_v12 = vsub.f32 %v2153_v48, %v3913_v44 }
 0x311   : > { %v1424_v53 = vpop.permute.xlu1 %1423  ;;  %v2081_v6 = vpop.permute.xlu2 %2080 }
 0x312   : > { %v1458_v57 = vmul.f32 %v1424_v53, %v1378_v8  ;;  %v2124_v58 = vadd.f32 %v2081_v6, %v2028_v1  ;;  %2202 = vrot.lane.b32.xlu0 %v2169_v12, %s3430_s29 }
 0x314   : > { %v1474_v39 = vadd.f32 %v1458_v57, %v4042_v17  ;;  %v2949_v43 = vadd.f32 -1.0, %v2124_v58  ;;  %v2037_v58 = vmul.f32 %v4059_v36, %v4059_v36 }
 0x316   : > { %v1483_v59 = vpack.c.bf16 %v1474_v39, %v1473_v20  ;;  %v2156_v4 = vmul.f32 0.5, %v2949_v43  ;;  %v2030_v20 = vmul.f32 %v3981_v46, %v3981_v46 }
 0x318   : > { %v2172_v44 = vsub.f32 %v2156_v4, %v3946_v29  ;;  %2847 = vmatmul.msk.bf16.gmra.mxu0 %vm1521_vm0, %v1483_v59  ;;  %v1379_v29 = vld [vmem:[%s4081_s17 + $0x70] sm:$0xff]  ;;  %s4751_s17 = sld [smem:[#allocation35_spill]] }
 0x319   : > { %v2087_v15 = vpop.permute.xlu2 %2086  ;;  %v2073_v16 = vpop.permute.xlu1 %2072  ;;  %v1459_v47 = vmul.f32 %v1426_v26, %v1379_v29 }
 0x31a   : > { %v2127_v0 = vadd.f32 %v2087_v15, %v2031_v35  ;;  %v2120_v17 = vadd.f32 %v2073_v16, %v2024_v5  ;;  %2208 = vrot.lane.b32.xlu0 %v2172_v44, %s3430_s29 }
 0x31b   : > { %v1475_v1 = vadd.f32 %v1459_v47, %v4053_v31  ;;  %v2026_v31 = vmul.f32 %v3937_v25, %v3937_v25  ;;  %v2033_v25 = vmul.f32 %v4014_v62, %v4014_v62  ;;  %v4228_v47 = vld [vmem:[%s4748_s20] ss:$0 sm:$0xff]  ;;  %s4400_s20 = scalar_lea.vmem [#allocation12], %s3653_s12  ;;  %s3035_s12 = sshll.u32 %s3549_s30, 8 }
 0x31c   : > { %v2952_v27 = vadd.f32 -1.0, %v2127_v0  ;;  %v2945_v49 = vadd.f32 -1.0, %v2120_v17  ;;  %v2029_v17 = vmul.f32 %v3970_v41, %v3970_v41  ;;  %v2941_v41 = vld [vmem:[%s4747_s21 + $0x78] sm:$0xf0] }
 0x31e   : > { %v2159_v37 = vmul.f32 0.5, %v2952_v27  ;;  %v2152_v54 = vmul.f32 0.5, %v2945_v49  ;;  %v2939_v27 = vld [vmem:[%s4747_s21 + $0x70] sm:$0xf]  ;;  %v3033_v49 = vld [vmem:[%s4747_s21 + $0x74] sm:$0xf0]  ;;  %s2494_s13 = scalar_lea.hbm %s4751_s17, %s3035_s12 }
 0x31f   : > { %s2497_s24 = sshll.u32 %s2494_s13, 4  ;;  %s3332_s10 = scalar_lea.hbm %s4751_s17, 512  ;;  %s4532_s24 = int_to_ptr.hbm [resolvable:$true] %s2497_s24 }
 0x320   : > { %v2175_v33 = vsub.f32 %v2159_v37, %v3979_v45  ;;  %v2168_v51 = vsub.f32 %v2152_v54, %v3906_v9  ;;  %s3326_s23 = sshra.s32 %s4532_s24, 4  ;;  %s3327_s23 = int_to_ptr.hbm [resolvable:$true] %s3326_s23 }
 0x321   : > { %v2093_v18 = vpop.permute.xlu2 %2092  ;;  %v2079_v23 = vpop.permute.xlu1 %2078  ;;  %s3328_s25 = scalar_lea.hbm %s3327_s23, 256  ;;  %p3333_p10 = scmp.lt.s32.totalorder %s3327_s23, %s4751_s17 }
 0x322   : > { %v2130_v48 = vadd.f32 %v2093_v18, %v2034_v13  ;;  %v2123_v8 = vadd.f32 %v2079_v23, %v2027_v28  ;;  %v1428_v12 = vpop.permute.xlu0 %1427  ;;  %2214 = vrot.lane.b32.xlu0 %v2175_v33, %s3430_s29  ;;  %2200 = vrot.lane.b32.xlu2 %v2168_v51, %s3430_s29  ;;  %v2036_v18 = vmul.f32 %v4047_v22, %v4047_v22  ;;  %p3329_p4 = scmp.ne.s32.totalorder %s3327_s23, %s3328_s25  ;;  %p3334_p11 = scmp.lt.s32.totalorder %s3332_s10, %s3328_s25 }
 0x323   : > { %v1460_v45 = vmul.f32 %v1428_v12, %v1380_v38 }
 0x324   : > { %v2955_v60 = vadd.f32 -1.0, %v2130_v48  ;;  %v2948_v9 = vadd.f32 -1.0, %v2123_v8  ;;  %v2032_v8 = vmul.f32 %v4003_v56, %v4003_v56  ;;  %p3330_p8 = pnand %p3329_p4, %p3594_p3  ;;  %p3335_p9 = por %p3334_p11, %p3333_p10 }
 0x325   : > { %v1476_v3 = vadd.f32 %v1460_v45, %v4065_v42 }
 0x326   : > { %v2162_v53 = vmul.f32 0.5, %v2955_v60  ;;  %v2155_v30 = vmul.f32 0.5, %v2948_v9  ;;  %p3331_p2 = pneg %p3330_p8 }
 0x327   : > { %v1484_v6 = vpack.c.bf16 %v1476_v3, %v1475_v1 }
 0x328   : > { %v2178_v26 = vsub.f32 %v2162_v53, %v4012_v61  ;;  %v2171_v57 = vsub.f32 %v2155_v30, %v3935_v24  ;;  %p3336_p12 = pnand %p3335_p9, %p3331_p2 }
 0x329   : > { %2848 = vmatmul.msk.bf16.gmra.mxu0 %vm1521_vm0, %v1484_v6  ;;  %v2099_v39 = vpop.permute.xlu2 %2098  ;;  %v2085_v43 = vpop.permute.xlu1 %2084 }
 0x32a   : > { %v2133_v42 = vadd.f32 %v2099_v39, %v2037_v58  ;;  %v2126_v59 = vadd.f32 %v2085_v43, %v2030_v20  ;;  %v2077_v4 = vpop.permute.xlu0 %2076  ;;  %2220 = vrot.lane.b32.xlu0 %v2178_v26, %s3430_s29  ;;  %2206 = vrot.lane.b32.xlu2 %v2171_v57, %s3430_s29  ;;  %v2039_v26 = vmul.f32 %v4088_v63, %v4088_v63  ;;  %v2931_v57 = vld [vmem:[%s4747_s21 + $0x60] sm:$0xf]  ;;  %v3031_v58 = vld [vmem:[%s4747_s21 + $0x64] sm:$0xf0] }
 0x32b   : > { %v2122_v24 = vadd.f32 %v2077_v4, %v2026_v31  ;;  %v2035_v43 = vmul.f32 %v4036_v11, %v4036_v11  ;;  %v2932_v31 = vor.u32 %v3031_v58, %v2931_v57  ;;  %v2933_v63 = vld [vmem:[%s4747_s21 + $0x68] sm:$0xf0] }
 0x32c   : > { %v2958_v61 = vadd.f32 -1.0, %v2133_v42  ;;  %v2951_v36 = vadd.f32 -1.0, %v2126_v59 }
 0x32d   : > { %v2947_v44 = vadd.f32 -1.0, %v2122_v24 }
 0x32e   : > { %v2165_v35 = vmul.f32 0.5, %v2958_v61  ;;  %v2158_v46 = vmul.f32 0.5, %v2951_v36 }
 0x32f   : > { %v2154_v5 = vmul.f32 0.5, %v2947_v44 }
 0x330   : > { %v2181_v15 = vsub.f32 %v2165_v35, %v4045_v21  ;;  %v2174_v16 = vsub.f32 %v2158_v46, %v3968_v40  ;;  %v3032_v40 = vld [vmem:[%s4747_s21 + $0x74] sm:$0xf] }
 0x331   : > { %v2170_v7 = vsub.f32 %v2154_v5, %v3924_v19  ;;  %v2091_v0 = vpop.permute.xlu1 %2090  ;;  %v2940_v19 = vor.u32 %v3033_v49, %v2939_v27  ;;  %v2944_v37 = vor.u32 %v3032_v40, %v2941_v41  ;;  %v2925_v41 = vld [vmem:[%s4747_s21 + $0x58] sm:$0xf0] }
 0x332   : > { %v2129_v21 = vadd.f32 %v2091_v0, %v2033_v25  ;;  %v2083_v62 = vpop.permute.xlu0 %2082  ;;  %2226 = vrot.lane.b32.xlu0 %v2181_v15, %s3430_s29  ;;  %2212 = vrot.lane.b32.xlu2 %v2174_v16, %s3430_s29  ;;  %v2038_v15 = vmul.f32 %v4072_v52, %v4072_v52  ;;  %v3029_v52 = vld [vmem:[%s4747_s21 + $0x54] sm:$0xf0] }
 0x333   : > { %v2125_v29 = vadd.f32 %v2083_v62, %v2029_v17  ;;  %2204 = vrot.lane.b32.xlu1 %v2170_v7, %s3430_s29  ;;  %1862 = vmatpush.bf16.msrb.mxu2 %v2940_v19  ;;  %v3028_v19 = vld [vmem:[%s4747_s21 + $0x54] sm:$0xf] }
 0x334   : > { %v2954_v54 = vadd.f32 -1.0, %v2129_v21  ;;  %1911 = vmatpush.bf16.msrb.mxu3 %v2944_v37  ;;  %v2928_v37 = vor.u32 %v3028_v19, %v2925_v41 }
 0x335   : > { %v2950_v33 = vadd.f32 -1.0, %v2125_v29  ;;  %v1555_v51 = vpop.f32.mrf.mxu0 }
 0x336   : > { %v2161_v13 = vmul.f32 0.5, %v2954_v54 }
 0x337   : > { %v2157_v28 = vmul.f32 0.5, %v2950_v33  ;;  %1863 = vmatpush.bf16.msrb.mxu2 %v2932_v31 }
 0x338   : > { %v2177_v38 = vsub.f32 %v2161_v13, %v4001_v55  ;;  %v1556_v55 = vadd.f32 %v4228_v47, %v1555_v51 }
 0x339   : > { %v2173_v23 = vsub.f32 %v2157_v28, %v3957_v34  ;;  %v2097_v48 = vpop.permute.xlu1 %2096 }
 0x33a   : > { %v2132_v12 = vadd.f32 %v2097_v48, %v2036_v18  ;;  %v2089_v45 = vpop.permute.xlu0 %2088  ;;  %2218 = vrot.lane.b32.xlu2 %v2177_v38, %s3430_s29  ;;  %v1595_v30 = vmax.f32 %v1556_v55, 0.0  ;;  %v2915_v18 = vld [vmem:[%s4747_s21 + $0x40] sm:$0xf]  ;;  %v3026_v48 = vld [vmem:[%s4747_s21 + $0x44] sm:$0xf] }
 0x33b   : > { %v2128_v60 = vadd.f32 %v2089_v45, %v2032_v8  ;;  %2210 = vrot.lane.b32.xlu1 %v2173_v23, %s3430_s29  ;;  %v3027_v23 = vld [vmem:[%s4747_s21 + $0x44] sm:$0xf0] }
 0x33c   : > { %v2957_v9 = vadd.f32 -1.0, %v2132_v12  ;;  %v2916_v8 = vor.u32 %v3027_v23, %v2915_v18  ;;  %v2917_v12 = vld [vmem:[%s4747_s21 + $0x48] sm:$0xf0] }
 0x33d   : > { %v2953_v1 = vadd.f32 -1.0, %v2128_v60  ;;  %v1557_v3 = vpop.f32.mrf.mxu0  ;;  %v2920_v45 = vor.u32 %v3026_v48, %v2917_v12  ;;  %v2885_v48 = vld [vmem:[%s4747_s21 + $0x8] sm:$0xf0] }
 0x33e   : > { %v2164_v53 = vmul.f32 0.5, %v2957_v9  ;;  %v1558_v22 = vadd.f32 %v4228_v47, %v1557_v3 }
 0x33f   : > { %v2160_v34 = vmul.f32 0.5, %v2953_v1 }
 0x340   : > { %v2180_v6 = vsub.f32 %v2164_v53, %v4034_v10  ;;  %v1596_v56 = vmax.f32 %v1558_v22, 0.0  ;;  %v3030_v10 = vld [vmem:[%s4747_s21 + $0x64] sm:$0xf] }
 0x341   : > { %v2176_v20 = vsub.f32 %v2160_v34, %v3990_v50  ;;  %v2103_v39 = vpop.permute.xlu1 %2102  ;;  %v2936_v24 = vor.u32 %v3030_v10, %v2933_v63  ;;  %v2907_v34 = vld [vmem:[%s4747_s21 + $0x30] sm:$0xf] }
 0x342   : > { %v1611_v42 = vpack.c.bf16 %v1596_v56, %v1595_v30  ;;  %v2135_v59 = vadd.f32 %v2103_v39, %v2039_v26  ;;  %v2095_v4 = vpop.permute.xlu0 %2094  ;;  %2224 = vrot.lane.b32.xlu2 %v2180_v6, %s3430_s29  ;;  %v3025_v30 = vld [vmem:[%s4747_s21 + $0x34] sm:$0xf0]  ;;  %v3024_v6 = vld [vmem:[%s4747_s21 + $0x34] sm:$0xf]  ;;  %v2909_v26 = vld [vmem:[%s4747_s21 + $0x38] sm:$0xf0] }
 0x343   : > { %v2131_v50 = vadd.f32 %v2095_v4, %v2035_v43  ;;  %2216 = vrot.lane.b32.xlu1 %v2176_v20, %s3430_s29  ;;  %1912 = vmatpush.bf16.msrb.mxu3 %v2936_v24  ;;  %v2908_v56 = vor.u32 %v3025_v30, %v2907_v34  ;;  %v2912_v57 = vor.u32 %v3024_v6, %v2909_v26  ;;  %v2899_v4 = vld [vmem:[%s4747_s21 + $0x20] sm:$0xf]  ;;  %v3023_v24 = vld [vmem:[%s4747_s21 + $0x24] sm:$0xf0] }
 0x344   : > { %v2960_v11 = vadd.f32 -1.0, %v2135_v59  ;;  %1695 = vmatmul.bf16.vlgmr.msrb.gmra.mxu1 %v1611_v42 }
 0x345   : > { %v2956_v61 = vadd.f32 -1.0, %v2131_v50  ;;  %v1560_v36 = vpop.f32.mrf.mxu0  ;;  %v3022_v50 = vld [vmem:[%s4747_s21 + $0x24] sm:$0xf] }
 0x346   : > { %v2167_v44 = vmul.f32 0.5, %v2960_v11  ;;  %v1561_v7 = vadd.f32 %v4228_v47, %v1560_v36  ;;  %v2900_v11 = vor.u32 %v3023_v24, %v2899_v4  ;;  %v4369_v24 = vld [vmem:[%s4749_s1] ss:$0 sm:$0xff] }
 0x347   : > { %v2163_v35 = vmul.f32 0.5, %v2956_v61  ;;  %1913 = vmatpush.bf16.msrb.mxu3 %v2928_v37  ;;  %v2901_v61 = vld [vmem:[%s4747_s21 + $0x28] sm:$0xf0] }
 0x348   : > { %v2183_v46 = vsub.f32 %v2167_v44, %v4068_v14  ;;  %v1597_v40 = vmax.f32 %v1561_v7, 0.0  ;;  %v2904_v44 = vor.u32 %v3022_v50, %v2901_v61 }
 0x349   : > { %v2179_v5 = vsub.f32 %v2163_v35, %v4023_v2  ;;  %v2923_v2 = vld [vmem:[%s4747_s21 + $0x50] sm:$0xf] }
 0x34a   : > { %v2101_v16 = vpop.permute.xlu0 %2100  ;;  %2230 = vrot.lane.b32.xlu2 %v2183_v46, %s3430_s29  ;;  %v2924_v62 = vor.u32 %v3029_v52, %v2923_v2 }
 0x34b   : > { %v2134_v25 = vadd.f32 %v2101_v16, %v2038_v15  ;;  %2222 = vrot.lane.b32.xlu1 %v2179_v5, %s3430_s29  ;;  %1914 = vmatpush.bf16.msrb.mxu3 %v2920_v45 }
 0x34c   : > { %1864 = vmatpush.bf16.msrb.mxu2 %v2924_v62 }
 0x34d   : > { %v2959_v0 = vadd.f32 -1.0, %v2134_v25  ;;  %v1562_v17 = vpop.f32.mrf.mxu0 }
 0x34e   : > { %v1563_v27 = vadd.f32 %v4228_v47, %v1562_v17 }
 0x34f   : > { %v2166_v49 = vmul.f32 0.5, %v2959_v0  ;;  %1915 = vmatpush.bf16.msrb.mxu3 %v2912_v57 }
 0x350   : > { %v1598_v14 = vmax.f32 %v1563_v27, 0.0  ;;  %1865 = vmatpush.bf16.msrb.mxu2 %v2916_v8 }
 0x351   : > { %v2182_v21 = vsub.f32 %v2166_v49, %v4056_v32  ;;  %v2891_v49 = vld [vmem:[%s4747_s21 + $0x10] sm:$0xf] }
 0x352   : > { %v1612_v29 = vpack.c.bf16 %v1598_v14, %v1597_v40  ;;  %v3021_v40 = vld [vmem:[%s4747_s21 + $0x14] sm:$0xf0]  ;;  %v3020_v14 = vld [vmem:[%s4747_s21 + $0x14] sm:$0xf] }
 0x353   : > { %2228 = vrot.lane.b32.xlu1 %v2182_v21, %s3430_s29  ;;  %1916 = vmatpush.bf16.msrb.mxu3 %v2904_v44  ;;  %v2892_v52 = vor.u32 %v3021_v40, %v2891_v49  ;;  %v2893_v21 = vld [vmem:[%s4747_s21 + $0x18] sm:$0xf0]  ;;  %s2495_s29 = sshll.u32 %s4400_s20, 4  ;;  %s4530_s29 = int_to_ptr.vmem [resolvable:$true] %s2495_s29 }
 0x354   : > { %1700 = vmatmul.bf16.gmra.mxu1 %v1612_v29  ;;  %1866 = vmatpush.bf16.msrb.mxu2 %v2908_v56  ;;  %v2896_v41 = vor.u32 %v3020_v14, %v2893_v21 }
 0x355   : > { %v1565_v54 = vpop.f32.mrf.mxu0 }
 0x356   : > { %v1566_v33 = vadd.f32 %v4228_v47, %v1565_v54 }
 0x357   : > { %1917 = vmatpush.bf16.msrb.mxu3 %v2896_v41 }
 0x358   : > { %v1599_v13 = vmax.f32 %v1566_v33, 0.0  ;;  %1867 = vmatpush.bf16.msrb.mxu2 %v2900_v11 }
 0x35c   : > { %1868 = vmatpush.bf16.msrb.mxu2 %v2892_v52 }
 0x35d   : > { %v1567_v32 = vpop.f32.mrf.mxu0 }
 0x35e   : > { %v1568_v51 = vadd.f32 %v4228_v47, %v1567_v32 }
 0x360   : > { %v1600_v28 = vmax.f32 %v1568_v51, 0.0  ;;  %v2883_v51 = vld [vmem:[%s4747_s21] sm:$0xf] }
 0x362   : > { %v1613_v38 = vpack.c.bf16 %v1600_v28, %v1599_v13  ;;  %v3019_v13 = vld [vmem:[%s4747_s21 + $0x4] sm:$0xf0]  ;;  %v3018_v28 = vld [vmem:[%s4747_s21 + $0x4] sm:$0xf] }
 0x363   : > { %v2884_v23 = vor.u32 %v3019_v13, %v2883_v51  ;;  %v2888_v8 = vor.u32 %v3018_v28, %v2885_v48 }
 0x364   : > { %1705 = vmatmul.bf16.gmra.mxu1 %v1613_v38 }
 0x365   : > { %v1570_v60 = vpop.f32.mrf.mxu0  ;;  %1869 = vmatpush.bf16.msrb.mxu2 %v2884_v23  ;;  %1918 = vmatpush.bf16.msrb.mxu3 %v2888_v8 }
 0x366   : > { %v1571_v55 = vadd.f32 %v4228_v47, %v1570_v60 }
 0x368   : > { %v1601_v3 = vmax.f32 %v1571_v55, 0.0 }
 0x36d   : > { %v1572_v9 = vpop.f32.mrf.mxu0 }
 0x36e   : > { %v1573_v1 = vadd.f32 %v4228_v47, %v1572_v9 }
 0x370   : > { %v1602_v53 = vmax.f32 %v1573_v1, 0.0 }
 0x372   : > { %v1614_v22 = vpack.c.bf16 %v1602_v53, %v1601_v3 }
 0x374   : > { %1710 = vmatmul.bf16.gmra.mxu1 %v1614_v22 }
 0x375   : > { %v1575_v58 = vpop.f32.mrf.mxu0 }
 0x376   : > { %v1576_v20 = vadd.f32 %v4228_v47, %v1575_v58 }
 0x378   : > { %v1603_v63 = vmax.f32 %v1576_v20, 0.0 }
 0x37c   : > { %v2201_v39 = vpop.permute.xlu2 %2200 }
 0x37d   : > { %v1577_v43 = vpop.f32.mrf.mxu0  ;;  %v2248_v31 = vsel %vm1521_vm0, %v2201_v39, 0.0 }
 0x37e   : > { %v1578_v10 = vadd.f32 %v4228_v47, %v1577_v43  ;;  %2249 = vadd.xlane.f32.xlu0 %v2248_v31 }
 0x380   : > { %v1604_v42 = vmax.f32 %v1578_v10, 0.0 }
 0x382   : > { %v1615_v59 = vpack.c.bf16 %v1604_v42, %v1603_v63 }
 0x384   : > { %1715 = vmatmul.bf16.gmra.mxu1 %v1615_v59  ;;  %v2203_v36 = vpop.permute.xlu0 %2202  ;;  %v2207_v45 = vpop.permute.xlu2 %2206 }
 0x385   : > { %v1580_v35 = vpop.f32.mrf.mxu0  ;;  %v2251_v46 = vsel %vm1521_vm0, %v2203_v36, 0.0  ;;  %v2257_v56 = vsel %vm1521_vm0, %v2207_v45, 0.0 }
 0x386   : > { %2252 = vadd.xlane.f32.xlu1 %v2251_v46  ;;  %v1581_v5 = vadd.f32 %v4228_v47, %v1580_v35 }
 0x388   : > { %v1605_v0 = vmax.f32 %v1581_v5, 0.0 }
 0x38c   : > { %v2209_v15 = vpop.permute.xlu0 %2208  ;;  %v2213_v53 = vpop.permute.xlu2 %2212 }
 0x38d   : > { %v1582_v16 = vpop.f32.mrf.mxu0  ;;  %v2260_v25 = vsel %vm1521_vm0, %v2209_v15, 0.0  ;;  %v2266_v31 = vsel %vm1521_vm0, %v2213_v53, 0.0 }
 0x38e   : > { %v1583_v7 = vadd.f32 %v4228_v47, %v1582_v16  ;;  %2261 = vadd.xlane.f32.xlu0 %v2260_v25 }
 0x390   : > { %v1606_v17 = vmax.f32 %v1583_v7, 0.0 }
 0x392   : > { %v1616_v27 = vpack.c.bf16 %v1606_v17, %v1605_v0 }
 0x394   : > { %1720 = vmatmul.bf16.gmra.mxu1 %v1616_v27  ;;  %v2215_v2 = vpop.permute.xlu0 %2214  ;;  %v2219_v10 = vpop.permute.xlu2 %2218 }
 0x395   : > { %v1585_v62 = vpop.f32.mrf.mxu0  ;;  %v2269_v19 = vsel %vm1521_vm0, %v2215_v2, 0.0  ;;  %v2275_v59 = vsel %vm1521_vm0, %v2219_v10, 0.0 }
 0x396   : > { %2270 = vadd.xlane.f32.xlu0 %v2269_v19  ;;  %v1586_v29 = vadd.f32 %v4228_v47, %v1585_v62 }
 0x398   : > { %v1607_v38 = vmax.f32 %v1586_v29, 0.0 }
 0x39c   : > { %v2221_v37 = vpop.permute.xlu0 %2220 }
 0x39d   : > { %v1587_v54 = vpop.f32.mrf.mxu0  ;;  %v2278_v33 = vsel %vm1521_vm0, %v2221_v37, 0.0 }
 0x39e   : > { %v1588_v32 = vadd.f32 %v4228_v47, %v1587_v54  ;;  %2279 = vadd.xlane.f32.xlu0 %v2278_v33 }
 0x3a0   : > { %v1608_v18 = vmax.f32 %v1588_v32, 0.0 }
 0x3a2   : > { %v1617_v12 = vpack.c.bf16 %v1608_v18, %v1607_v38 }
 0x3a4   : > { %1725 = vmatmul.bf16.gmra.mxu1 %v1617_v12  ;;  %v2227_v60 = vpop.permute.xlu0 %2226 }
 0x3a5   : > { %v2205_v55 = vpop.permute.xlu1 %2204  ;;  %v2287_v9 = vsel %vm1521_vm0, %v2227_v60, 0.0 }
 0x3a6   : > { %v1590_v1 = vpop.f32.mrf.mxu0  ;;  %v2254_v3 = vsel %vm1521_vm0, %v2205_v55, 0.0  ;;  %2288 = vadd.xlane.f32.xlu0 %v2287_v9 }
 0x3a7   : > { %2255 = vadd.xlane.f32.xlu2 %v2254_v3  ;;  %v1591_v22 = vadd.f32 %v4228_v47, %v1590_v1 }
 0x3a9   : > { %v1609_v57 = vmax.f32 %v1591_v22, 0.0 }
 0x3ad   : > { %v2211_v34 = vpop.permute.xlu1 %2210 }
 0x3ae   : > { %v1592_v30 = vpop.f32.mrf.mxu0  ;;  %v2263_v6 = vsel %vm1521_vm0, %v2211_v34, 0.0 }
 0x3af   : > { %v1593_v26 = vadd.f32 %v4228_v47, %v1592_v30  ;;  %2264 = vadd.xlane.f32.xlu1 %v2263_v6  ;;  %2258 = vadd.xlane.f32.xlu2 %v2257_v56  ;;  %v2225_v47 = vpop.permute.xlu2 %2224 }
 0x3b0   : > { %v2284_v61 = vsel %vm1521_vm0, %v2225_v47, 0.0 }
 0x3b1   : > { %v1610_v58 = vmax.f32 %v1593_v26, 0.0 }
 0x3b3   : > { %v1618_v20 = vpack.c.bf16 %v1610_v58, %v1609_v57 }
 0x3b5   : > { %1730 = vmatmul.bf16.gmra.mxu1 %v1618_v20  ;;  %v2217_v39 = vpop.permute.xlu1 %2216 }
 0x3b6   : > { %v2272_v43 = vsel %vm1521_vm0, %v2217_v39, 0.0 }
 0x3b7   : > { %2273 = vadd.xlane.f32.xlu1 %v2272_v43  ;;  %2267 = vadd.xlane.f32.xlu2 %v2266_v31  ;;  %v2231_v46 = vpop.permute.xlu2 %2230 }
 0x3b8   : > { %v2293_v25 = vsel %vm1521_vm0, %v2231_v46, 0.0 }
 0x3bd   : > { %v2223_v63 = vpop.permute.xlu1 %2222 }
 0x3be   : > { %v2281_v42 = vsel %vm1521_vm0, %v2223_v63, 0.0 }
 0x3bf   : > { %2282 = vadd.xlane.f32.xlu1 %v2281_v42  ;;  %2276 = vadd.xlane.f32.xlu2 %v2275_v59  ;;  %v1776_v59 = vld [vmem:[%s4750_s19] sm:$0x3] }
 0x3c0   : > { %v4393_v47 = vperm.slane %v1776_v59, 0 }
 0x3c1   : > { %v1696_v4 = vpop.f32.mrf.mxu1 }
 0x3c2   : > { %v1697_v36 = vadd.f32 %v4369_v24, %v1696_v4  ;;  %v4395_v4 = vperm.slane %v1776_v59, 1 }
 0x3c4   : > { %v1736_v5 = vmax.f32 %v1697_v36, 0.0 }
 0x3c5   : > { %v2229_v50 = vpop.permute.xlu1 %2228 }
 0x3c6   : > { %v2290_v11 = vsel %vm1521_vm0, %v2229_v50, 0.0 }
 0x3c7   : > { %2291 = vadd.xlane.f32.xlu1 %v2290_v11  ;;  %2285 = vadd.xlane.f32.xlu2 %v2284_v61 }
 0x3c9   : > { %v1698_v44 = vpop.f32.mrf.mxu1 }
 0x3ca   : > { %v1699_v35 = vadd.f32 %v4369_v24, %v1698_v44 }
 0x3cc   : > { %v1737_v15 = vmax.f32 %v1699_v35, 0.0  ;;  %v3160_v35 = vld [vmem:[%s3657_s14] sm:$0xff] }
 0x3ce   : > { %v1752_v16 = vpack.c.bf16 %v1737_v15, %v1736_v5  ;;  %v3161_v5 = vld [vmem:[%s3657_s14 + $0x8] sm:$0xff] }
 0x3cf   : > { %2294 = vadd.xlane.f32.xlu2 %v2293_v25 }
 0x3d0   : > { %1870 = vmatmul.bf16.vlgmr.msrb.gmra.mxu2 %v1752_v16  ;;  %1919 = vmatmul.bf16.vlgmr.msrb.gmra.mxu3 %v1752_v16 }
 0x3d1   : > { %v1701_v7 = vpop.f32.mrf.mxu1 }
 0x3d2   : > { %v1702_v0 = vadd.f32 %v4369_v24, %v1701_v7 }
 0x3d4   : > { %v1738_v49 = vmax.f32 %v1702_v0, 0.0 }
 0x3d9   : > { %v1703_v17 = vpop.f32.mrf.mxu1 }
 0x3da   : > { %v1704_v27 = vadd.f32 %v4369_v24, %v1703_v17 }
 0x3dc   : > { %v1739_v40 = vmax.f32 %v1704_v27, 0.0 }
 0x3de   : > { %v1753_v14 = vpack.c.bf16 %v1739_v40, %v1738_v49 }
 0x3e0   : > { %1875 = vmatmul.bf16.gmra.mxu2 %v1753_v14  ;;  %1924 = vmatmul.bf16.gmra.mxu3 %v1753_v14 }
 0x3e1   : > { %v1706_v2 = vpop.f32.mrf.mxu1 }
 0x3e2   : > { %v1707_v52 = vadd.f32 %v4369_v24, %v1706_v2  ;;  %v3162_v2 = vld [vmem:[%s3657_s14 + $0x10] sm:$0xff] }
 0x3e4   : > { %v1740_v19 = vmax.f32 %v1707_v52, 0.0 }
 0x3e9   : > { %v1708_v21 = vpop.f32.mrf.mxu1 }
 0x3ea   : > { %v1709_v62 = vadd.f32 %v4369_v24, %v1708_v21  ;;  %v3163_v21 = vld [vmem:[%s3657_s14 + $0x18] sm:$0xff] }
 0x3ec   : > { %v1741_v41 = vmax.f32 %v1709_v62, 0.0 }
 0x3ee   : > { %v1754_v29 = vpack.c.bf16 %v1741_v41, %v1740_v19 }
 0x3f0   : > { %1880 = vmatmul.bf16.gmra.mxu2 %v1754_v29  ;;  %1929 = vmatmul.bf16.gmra.mxu3 %v1754_v29 }
 0x3f1   : > { %v1711_v37 = vpop.f32.mrf.mxu1 }
 0x3f2   : > { %v1712_v54 = vadd.f32 %v4369_v24, %v1711_v37 }
 0x3f4   : > { %v1742_v51 = vmax.f32 %v1712_v54, 0.0 }
 0x3f9   : > { %v1713_v33 = vpop.f32.mrf.mxu1 }
 0x3fa   : > { %v1714_v32 = vadd.f32 %v4369_v24, %v1713_v33 }
 0x3fc   : > { %v1743_v13 = vmax.f32 %v1714_v32, 0.0 }
 0x3fe   : > { %v1755_v28 = vpack.c.bf16 %v1743_v13, %v1742_v51 }
 0x400   : > { %1885 = vmatmul.bf16.gmra.mxu2 %v1755_v28  ;;  %1934 = vmatmul.bf16.gmra.mxu3 %v1755_v28  ;;  %v3164_v28 = vld [vmem:[%s3657_s14 + $0x20] sm:$0xff] }
 0x401   : > { %v1716_v38 = vpop.f32.mrf.mxu1 }
 0x402   : > { %v1717_v18 = vadd.f32 %v4369_v24, %v1716_v38 }
 0x404   : > { %v1744_v8 = vmax.f32 %v1717_v18, 0.0  ;;  %v3165_v18 = vld [vmem:[%s3657_s14 + $0x28] sm:$0xff] }
 0x409   : > { %v1718_v23 = vpop.f32.mrf.mxu1 }
 0x40a   : > { %v1719_v48 = vadd.f32 %v4369_v24, %v1718_v23 }
 0x40c   : > { %v1745_v12 = vmax.f32 %v1719_v48, 0.0 }
 0x40e   : > { %v1756_v45 = vpack.c.bf16 %v1745_v12, %v1744_v8 }
 0x410   : > { %1890 = vmatmul.bf16.gmra.mxu2 %v1756_v45  ;;  %1939 = vmatmul.bf16.gmra.mxu3 %v1756_v45 }
 0x411   : > { %v1721_v60 = vpop.f32.mrf.mxu1 }
 0x412   : > { %v1722_v55 = vadd.f32 %v4369_v24, %v1721_v60 }
 0x414   : > { %v1746_v3 = vmax.f32 %v1722_v55, 0.0 }
 0x419   : > { %v1723_v9 = vpop.f32.mrf.mxu1 }
 0x41a   : > { %v1724_v1 = vadd.f32 %v4369_v24, %v1723_v9 }
 0x41c   : > { %v1747_v53 = vmax.f32 %v1724_v1, 0.0 }
 0x41e   : > { %v1757_v22 = vpack.c.bf16 %v1747_v53, %v1746_v3  ;;  %v3166_v53 = vld [vmem:[%s3657_s14 + $0x30] sm:$0xff] }
 0x420   : > { %1895 = vmatmul.bf16.gmra.mxu2 %v1757_v22  ;;  %1944 = vmatmul.bf16.gmra.mxu3 %v1757_v22 }
 0x421   : > { %v1726_v34 = vpop.f32.mrf.mxu1 }
 0x422   : > { %v1727_v30 = vadd.f32 %v4369_v24, %v1726_v34  ;;  %v3167_v34 = vld [vmem:[%s3657_s14 + $0x38] sm:$0xff] }
 0x424   : > { %v1748_v26 = vmax.f32 %v1727_v30, 0.0 }
 0x429   : > { %v1728_v6 = vpop.f32.mrf.mxu1 }
 0x42a   : > { %v1729_v56 = vadd.f32 %v4369_v24, %v1728_v6 }
 0x42c   : > { %v1749_v57 = vmax.f32 %v1729_v56, 0.0 }
 0x42e   : > { %v1758_v58 = vpack.c.bf16 %v1749_v57, %v1748_v26 }
 0x430   : > { %1900 = vmatmul.bf16.gmra.mxu2 %v1758_v58  ;;  %1949 = vmatmul.bf16.gmra.mxu3 %v1758_v58 }
 0x432   : > { %v1731_v20 = vpop.f32.mrf.mxu1 }
 0x433   : > { %v1732_v39 = vadd.f32 %v4369_v24, %v1731_v20 }
 0x435   : > { %v1750_v10 = vmax.f32 %v1732_v39, 0.0 }
 0x43a   : > { %v1733_v43 = vpop.f32.mrf.mxu1 }
 0x43b   : > { %v1734_v31 = vadd.f32 %v4369_v24, %v1733_v43 }
 0x43d   : > { %v1751_v63 = vmax.f32 %v1734_v31, 0.0 }
 0x43f   : > { %v1759_v42 = vpack.c.bf16 %v1751_v63, %v1750_v10  ;;  %v3168_v10 = vld [vmem:[%s3657_s14 + $0x40] sm:$0xff] }
 0x441   : > { %1905 = vmatmul.bf16.gmra.mxu2 %v1759_v42  ;;  %1954 = vmatmul.bf16.gmra.mxu3 %v1759_v42  ;;  %v3169_v42 = vld [vmem:[%s3657_s14 + $0x48] sm:$0xff] }
 0x453   : > { %v1871_v50 = vpop.f32.mrf.mxu2  ;;  %v1920_v11 = vpop.f32.mrf.mxu3 }
 0x454   : > { %v1872_v61 = vadd.f32 %v1871_v50, %v4393_v47  ;;  %v1921_v24 = vadd.f32 %v1920_v11, %v4395_v4 }
 0x456   : > { %v1960_v36 = vmax.f32 %v1872_v61, 0.0  ;;  %v1961_v44 = vmax.f32 %v1921_v24, 0.0 }
 0x458   : > { %1992 = vst [vmem:[%s4400_s20] sm:$0xff] %v1960_v36  ;;  %v2296_v46 = vsub.f32 %v3160_v35, %v1960_v36  ;;  %v2297_v15 = vsub.f32 %v3161_v5, %v1961_v44 }
 0x459   : > { %1993 = vst [vmem:[%s4400_s20 + $0x8] sm:$0xff] %v1961_v44 }
 0x45a   : > { %v2328_v16 = vmul.f32 %v2296_v46, %v2296_v46  ;;  %v2329_v25 = vmul.f32 %v2297_v15, %v2297_v15  ;;  %v3170_v15 = vld [vmem:[%s3657_s14 + $0x50] sm:$0xff] }
 0x45b   : > { %v1873_v7 = vpop.f32.mrf.mxu2  ;;  %v1922_v0 = vpop.f32.mrf.mxu3 }
 0x45c   : > { %v1874_v17 = vadd.f32 %v1873_v7, %v4393_v47  ;;  %v1923_v27 = vadd.f32 %v1922_v0, %v4395_v4  ;;  %v2360_v49 = vadd.f32 %v2329_v25, %v2328_v16  ;;  %v3171_v25 = vld [vmem:[%s3657_s14 + $0x58] sm:$0xff] }
 0x45e   : > { %v1962_v40 = vmax.f32 %v1874_v17, 0.0  ;;  %v1963_v14 = vmax.f32 %v1923_v27, 0.0  ;;  %2361 = vadd.xlane.f32.xlu0 %v2360_v49 }
 0x460   : > { %1994 = vst [vmem:[%s4400_s20 + $0x10] sm:$0xff] %v1962_v40  ;;  %v2298_v52 = vsub.f32 %v3162_v2, %v1962_v40  ;;  %v2299_v62 = vsub.f32 %v3163_v21, %v1963_v14 }
 0x461   : > { %1995 = vst [vmem:[%s4400_s20 + $0x18] sm:$0xff] %v1963_v14 }
 0x462   : > { %v2330_v19 = vmul.f32 %v2298_v52, %v2298_v52  ;;  %v2331_v41 = vmul.f32 %v2299_v62, %v2299_v62  ;;  %v3172_v62 = vld [vmem:[%s3657_s14 + $0x60] sm:$0xff] }
 0x463   : > { %v1876_v29 = vpop.f32.mrf.mxu2  ;;  %v1925_v37 = vpop.f32.mrf.mxu3 }
 0x464   : > { %v1877_v54 = vadd.f32 %v1876_v29, %v4393_v47  ;;  %v1926_v33 = vadd.f32 %v1925_v37, %v4395_v4  ;;  %v2363_v32 = vadd.f32 %v2331_v41, %v2330_v19  ;;  %v3173_v41 = vld [vmem:[%s3657_s14 + $0x68] sm:$0xff] }
 0x466   : > { %v1964_v51 = vmax.f32 %v1877_v54, 0.0  ;;  %v1965_v13 = vmax.f32 %v1926_v33, 0.0  ;;  %2364 = vadd.xlane.f32.xlu1 %v2363_v32 }
 0x468   : > { %1996 = vst [vmem:[%s4400_s20 + $0x20] sm:$0xff] %v1964_v51  ;;  %v2300_v38 = vsub.f32 %v3164_v28, %v1964_v51  ;;  %v2301_v23 = vsub.f32 %v3165_v18, %v1965_v13 }
 0x469   : > { %1997 = vst [vmem:[%s4400_s20 + $0x28] sm:$0xff] %v1965_v13 }
 0x46a   : > { %v2332_v48 = vmul.f32 %v2300_v38, %v2300_v38  ;;  %v2333_v8 = vmul.f32 %v2301_v23, %v2301_v23  ;;  %v3174_v23 = vld [vmem:[%s3657_s14 + $0x70] sm:$0xff] }
 0x46b   : > { %v1878_v12 = vpop.f32.mrf.mxu2  ;;  %v1927_v45 = vpop.f32.mrf.mxu3 }
 0x46c   : > { %v1879_v60 = vadd.f32 %v1878_v12, %v4393_v47  ;;  %v1928_v55 = vadd.f32 %v1927_v45, %v4395_v4  ;;  %v2366_v9 = vadd.f32 %v2333_v8, %v2332_v48  ;;  %v3175_v8 = vld [vmem:[%s3657_s14 + $0x78] sm:$0xff] }
 0x46e   : > { %v1966_v1 = vmax.f32 %v1879_v60, 0.0  ;;  %v1967_v3 = vmax.f32 %v1928_v55, 0.0  ;;  %2367 = vadd.xlane.f32.xlu2 %v2366_v9 }
 0x470   : > { %1998 = vst [vmem:[%s4400_s20 + $0x30] sm:$0xff] %v1966_v1  ;;  %v2302_v22 = vsub.f32 %v3166_v53, %v1966_v1  ;;  %v2303_v30 = vsub.f32 %v3167_v34, %v1967_v3 }
 0x471   : > { %1999 = vst [vmem:[%s4400_s20 + $0x38] sm:$0xff] %v1967_v3 }
 0x472   : > { %v2334_v6 = vmul.f32 %v2302_v22, %v2302_v22  ;;  %v2335_v56 = vmul.f32 %v2303_v30, %v2303_v30  ;;  %v3176_v30 = vld [vmem:[%s3657_s14 + $0x80] sm:$0xff] }
 0x473   : > { %v1881_v26 = vpop.f32.mrf.mxu2  ;;  %v1930_v57 = vpop.f32.mrf.mxu3 }
 0x474   : > { %v1882_v58 = vadd.f32 %v1881_v26, %v4393_v47  ;;  %v1931_v20 = vadd.f32 %v1930_v57, %v4395_v4  ;;  %v2369_v39 = vadd.f32 %v2335_v56, %v2334_v6  ;;  %v3177_v56 = vld [vmem:[%s3657_s14 + $0x88] sm:$0xff] }
 0x476   : > { %v1968_v43 = vmax.f32 %v1882_v58, 0.0  ;;  %v1969_v31 = vmax.f32 %v1931_v20, 0.0  ;;  %2370 = vadd.xlane.f32.xlu0 %v2369_v39 }
 0x478   : > { %2000 = vst [vmem:[%s4400_s20 + $0x40] sm:$0xff] %v1968_v43  ;;  %v2304_v63 = vsub.f32 %v3168_v10, %v1968_v43  ;;  %v2305_v59 = vsub.f32 %v3169_v42, %v1969_v31 }
 0x479   : > { %2001 = vst [vmem:[%s4400_s20 + $0x48] sm:$0xff] %v1969_v31 }
 0x47a   : > { %v2336_v50 = vmul.f32 %v2304_v63, %v2304_v63  ;;  %v2337_v11 = vmul.f32 %v2305_v59, %v2305_v59  ;;  %v3178_v59 = vld [vmem:[%s3657_s14 + $0x90] sm:$0xff] }
 0x47b   : > { %v1883_v61 = vpop.f32.mrf.mxu2  ;;  %v1932_v24 = vpop.f32.mrf.mxu3 }
 0x47c   : > { %v1884_v36 = vadd.f32 %v1883_v61, %v4393_v47  ;;  %v1933_v44 = vadd.f32 %v1932_v24, %v4395_v4  ;;  %v2372_v35 = vadd.f32 %v2337_v11, %v2336_v50  ;;  %v3179_v11 = vld [vmem:[%s3657_s14 + $0x98] sm:$0xff]  ;;  %v4460_v24 = vpop.xlane.xlu0 %2249 }
 0x47e   : > { %v1970_v46 = vmax.f32 %v1884_v36, 0.0  ;;  %v1971_v5 = vmax.f32 %v1933_v44, 0.0  ;;  %2373 = vadd.xlane.f32.xlu1 %v2372_v35 }
 0x480   : > { %2002 = vst [vmem:[%s4400_s20 + $0x50] sm:$0xff] %v1970_v46  ;;  %v2306_v16 = vsub.f32 %v3170_v15, %v1970_v46  ;;  %v2307_v7 = vsub.f32 %v3171_v25, %v1971_v5  ;;  %v4464_v25 = vpop.xlane.xlu2 %2255 }
 0x481   : > { %2003 = vst [vmem:[%s4400_s20 + $0x58] sm:$0xff] %v1971_v5 }
 0x482   : > { %v2338_v0 = vmul.f32 %v2306_v16, %v2306_v16  ;;  %v2339_v17 = vmul.f32 %v2307_v7, %v2307_v7 }
 0x483   : > { %v1886_v27 = vpop.f32.mrf.mxu2  ;;  %v1935_v49 = vpop.f32.mrf.mxu3 }
 0x484   : > { %v1887_v40 = vadd.f32 %v1886_v27, %v4393_v47  ;;  %v1936_v14 = vadd.f32 %v1935_v49, %v4395_v4  ;;  %v2375_v2 = vadd.f32 %v2339_v17, %v2338_v0  ;;  %v3180_v17 = vld [vmem:[%s3657_s14 + $0xa0] sm:$0xff]  ;;  %v3181_v49 = vld [vmem:[%s3657_s14 + $0xa8] sm:$0xff] }
 0x486   : > { %v1972_v52 = vmax.f32 %v1887_v40, 0.0  ;;  %v1973_v21 = vmax.f32 %v1936_v14, 0.0  ;;  %2376 = vadd.xlane.f32.xlu2 %v2375_v2  ;;  %v4470_v14 = vpop.xlane.xlu1 %2252  ;;  %v4472_v2 = vpop.xlane.xlu0 %2261 }
 0x488   : > { %2004 = vst [vmem:[%s4400_s20 + $0x60] sm:$0xff] %v1972_v52  ;;  %v2308_v19 = vsub.f32 %v3172_v62, %v1972_v52  ;;  %v2309_v29 = vsub.f32 %v3173_v41, %v1973_v21 }
 0x489   : > { %2005 = vst [vmem:[%s4400_s20 + $0x68] sm:$0xff] %v1973_v21 }
 0x48a   : > { %v2340_v37 = vmul.f32 %v2308_v19, %v2308_v19  ;;  %v2341_v54 = vmul.f32 %v2309_v29, %v2309_v29 }
 0x48b   : > { %v1888_v33 = vpop.f32.mrf.mxu2  ;;  %v1937_v32 = vpop.f32.mrf.mxu3 }
 0x48c   : > { %v1889_v51 = vadd.f32 %v1888_v33, %v4393_v47  ;;  %v1938_v13 = vadd.f32 %v1937_v32, %v4395_v4  ;;  %v2378_v28 = vadd.f32 %v2341_v54, %v2340_v37  ;;  %v4476_v32 = vpop.xlane.xlu2 %2258 }
 0x48e   : > { %v1974_v38 = vmax.f32 %v1889_v51, 0.0  ;;  %v1975_v18 = vmax.f32 %v1938_v13, 0.0  ;;  %2379 = vadd.xlane.f32.xlu0 %v2378_v28  ;;  %v3182_v51 = vld [vmem:[%s3657_s14 + $0xb0] sm:$0xff]  ;;  %v3183_v28 = vld [vmem:[%s3657_s14 + $0xb8] sm:$0xff] }
 0x490   : > { %2006 = vst [vmem:[%s4400_s20 + $0x70] sm:$0xff] %v1974_v38  ;;  %v2310_v48 = vsub.f32 %v3174_v23, %v1974_v38  ;;  %v2311_v12 = vsub.f32 %v3175_v8, %v1975_v18 }
 0x491   : > { %2007 = vst [vmem:[%s4400_s20 + $0x78] sm:$0xff] %v1975_v18  ;;  %v4482_v18 = vpop.xlane.xlu1 %2264 }
 0x492   : > { %v2342_v45 = vmul.f32 %v2310_v48, %v2310_v48  ;;  %v2343_v60 = vmul.f32 %v2311_v12, %v2311_v12 }
 0x493   : > { %v1891_v55 = vpop.f32.mrf.mxu2  ;;  %v1940_v9 = vpop.f32.mrf.mxu3 }
 0x494   : > { %v1892_v1 = vadd.f32 %v1891_v55, %v4393_v47  ;;  %v1941_v3 = vadd.f32 %v1940_v9, %v4395_v4  ;;  %v2381_v53 = vadd.f32 %v2343_v60, %v2342_v45  ;;  %v4486_v9 = vpop.xlane.xlu0 %2270 }
 0x496   : > { %v1976_v22 = vmax.f32 %v1892_v1, 0.0  ;;  %v1977_v34 = vmax.f32 %v1941_v3, 0.0  ;;  %2382 = vadd.xlane.f32.xlu1 %v2381_v53  ;;  %v3184_v53 = vld [vmem:[%s3657_s14 + $0xc0] sm:$0xff] }
 0x498   : > { %2008 = vst [vmem:[%s4400_s20 + $0x80] sm:$0xff] %v1976_v22  ;;  %v2312_v6 = vsub.f32 %v3176_v30, %v1976_v22  ;;  %v2313_v26 = vsub.f32 %v3177_v56, %v1977_v34 }
 0x499   : > { %2009 = vst [vmem:[%s4400_s20 + $0x88] sm:$0xff] %v1977_v34  ;;  %v3185_v34 = vld [vmem:[%s3657_s14 + $0xc8] sm:$0xff] }
 0x49a   : > { %v2344_v57 = vmul.f32 %v2312_v6, %v2312_v6  ;;  %v2345_v58 = vmul.f32 %v2313_v26, %v2313_v26  ;;  %v4492_v6 = vpop.xlane.xlu2 %2267 }
 0x49b   : > { %v1893_v20 = vpop.f32.mrf.mxu2  ;;  %v1942_v39 = vpop.f32.mrf.mxu3 }
 0x49c   : > { %v1894_v43 = vadd.f32 %v1893_v20, %v4393_v47  ;;  %v1943_v31 = vadd.f32 %v1942_v39, %v4395_v4  ;;  %v2384_v10 = vadd.f32 %v2345_v58, %v2344_v57 }
 0x49e   : > { %v1978_v63 = vmax.f32 %v1894_v43, 0.0  ;;  %v1979_v42 = vmax.f32 %v1943_v31, 0.0  ;;  %2385 = vadd.xlane.f32.xlu2 %v2384_v10  ;;  %v4496_v31 = vpop.xlane.xlu1 %2273 }
 0x4a0   : > { %2010 = vst [vmem:[%s4400_s20 + $0x90] sm:$0xff] %v1978_v63  ;;  %v2314_v50 = vsub.f32 %v3178_v59, %v1978_v63  ;;  %v2315_v61 = vsub.f32 %v3179_v11, %v1979_v42  ;;  %v3186_v59 = vld [vmem:[%s3657_s14 + $0xd0] sm:$0xff]  ;;  %v3187_v11 = vld [vmem:[%s3657_s14 + $0xd8] sm:$0xff] }
 0x4a1   : > { %2011 = vst [vmem:[%s4400_s20 + $0x98] sm:$0xff] %v1979_v42  ;;  %v4498_v42 = vpop.xlane.xlu0 %2279 }
 0x4a2   : > { %v2346_v36 = vmul.f32 %v2314_v50, %v2314_v50  ;;  %v2347_v44 = vmul.f32 %v2315_v61, %v2315_v61 }
 0x4a3   : > { %v1896_v35 = vpop.f32.mrf.mxu2  ;;  %v1945_v46 = vpop.f32.mrf.mxu3 }
 0x4a4   : > { %v1897_v5 = vadd.f32 %v1896_v35, %v4393_v47  ;;  %v1946_v15 = vadd.f32 %v1945_v46, %v4395_v4  ;;  %v2387_v16 = vadd.f32 %v2347_v44, %v2346_v36 }
 0x4a6   : > { %v1980_v7 = vmax.f32 %v1897_v5, 0.0  ;;  %v1981_v0 = vmax.f32 %v1946_v15, 0.0  ;;  %2388 = vadd.xlane.f32.xlu0 %v2387_v16  ;;  %v4504_v15 = vpop.xlane.xlu2 %2276 }
 0x4a8   : > { %2012 = vst [vmem:[%s4400_s20 + $0xa0] sm:$0xff] %v1980_v7  ;;  %v2316_v27 = vsub.f32 %v3180_v17, %v1980_v7  ;;  %v2317_v40 = vsub.f32 %v3181_v49, %v1981_v0  ;;  %v4508_v17 = vpop.xlane.xlu1 %2282 }
 0x4a9   : > { %2013 = vst [vmem:[%s4400_s20 + $0xa8] sm:$0xff] %v1981_v0  ;;  %v2408_v0 = vlaneseq }
 0x4aa   : > { %v2348_v52 = vmul.f32 %v2316_v27, %v2316_v27  ;;  %v2349_v21 = vmul.f32 %v2317_v40, %v2317_v40  ;;  %v4510_v40 = vpop.xlane.xlu0 %2288 }
 0x4ab   : > { %v1898_v62 = vpop.f32.mrf.mxu2  ;;  %v1947_v19 = vpop.f32.mrf.mxu3 }
 0x4ac   : > { %v1899_v41 = vadd.f32 %v1898_v62, %v4393_v47  ;;  %v1948_v29 = vadd.f32 %v1947_v19, %v4395_v4  ;;  %v2390_v37 = vadd.f32 %v2349_v21, %v2348_v52  ;;  %v3188_v52 = vld [vmem:[%s3657_s14 + $0xe0] sm:$0xff]  ;;  %v3189_v62 = vld [vmem:[%s3657_s14 + $0xe8] sm:$0xff] }
 0x4ae   : > { %v1982_v54 = vmax.f32 %v1899_v41, 0.0  ;;  %v1983_v33 = vmax.f32 %v1948_v29, 0.0  ;;  %2391 = vadd.xlane.f32.xlu1 %v2390_v37  ;;  %v4516_v41 = vand.u32 127, %v2408_v0 }
 0x4b0   : > { %2014 = vst [vmem:[%s4400_s20 + $0xb0] sm:$0xff] %v1982_v54  ;;  %v2318_v13 = vsub.f32 %v3182_v51, %v1982_v54  ;;  %v2319_v38 = vsub.f32 %v3183_v28, %v1983_v33  ;;  %vm2427_vm1 = vcmp.eq.s32.totalorder %v4516_v41, 1  ;;  %vm2410_vm2 = vcmp.eq.s32.totalorder %v4516_v41, 0 }
 0x4b1   : > { %2015 = vst [vmem:[%s4400_s20 + $0xb8] sm:$0xff] %v1983_v33 }
 0x4b2   : > { %v2350_v23 = vmul.f32 %v2318_v13, %v2318_v13  ;;  %v2351_v48 = vmul.f32 %v2319_v38, %v2319_v38  ;;  %v4527_v38 = vpop.xlane.xlu2 %2285 }
 0x4b3   : > { %v1901_v8 = vpop.f32.mrf.mxu2  ;;  %v1950_v12 = vpop.f32.mrf.mxu3 }
 0x4b4   : > { %v1902_v45 = vadd.f32 %v1901_v8, %v4393_v47  ;;  %v1951_v60 = vadd.f32 %v1950_v12, %v4395_v4  ;;  %v2393_v55 = vadd.f32 %v2351_v48, %v2350_v23  ;;  %v3191_v12 = vld [vmem:[%s3657_s14 + $0xf8] sm:$0xff] }
 0x4b6   : > { %v1984_v1 = vmax.f32 %v1902_v45, 0.0  ;;  %v1985_v3 = vmax.f32 %v1951_v60, 0.0  ;;  %2394 = vadd.xlane.f32.xlu2 %v2393_v55  ;;  %v2428_v55 = vsel %vm2427_vm1, %v4460_v24, 0.0 }
 0x4b8   : > { %2016 = vst [vmem:[%s4400_s20 + $0xc0] sm:$0xff] %v1984_v1  ;;  %v2320_v22 = vsub.f32 %v3184_v53, %v1984_v1  ;;  %v2321_v30 = vsub.f32 %v3185_v34, %v1985_v3 }
 0x4b9   : > { %2017 = vst [vmem:[%s4400_s20 + $0xc8] sm:$0xff] %v1985_v3 }
 0x4ba   : > { %v2352_v56 = vmul.f32 %v2320_v22, %v2320_v22  ;;  %v2353_v26 = vmul.f32 %v2321_v30, %v2321_v30 }
 0x4bb   : > { %v1903_v57 = vpop.f32.mrf.mxu2  ;;  %v1952_v58 = vpop.f32.mrf.mxu3 }
 0x4bc   : > { %v1904_v20 = vadd.f32 %v1903_v57, %v4393_v47  ;;  %v1953_v39 = vadd.f32 %v1952_v58, %v4395_v4  ;;  %v2396_v43 = vadd.f32 %v2353_v26, %v2352_v56 }
 0x4be   : > { %v1986_v10 = vmax.f32 %v1904_v20, 0.0  ;;  %v1987_v63 = vmax.f32 %v1953_v39, 0.0  ;;  %2397 = vadd.xlane.f32.xlu0 %v2396_v43 }
 0x4c0   : > { %2018 = vst [vmem:[%s4400_s20 + $0xd0] sm:$0xff] %v1986_v10  ;;  %v2322_v50 = vsub.f32 %v3186_v59, %v1986_v10  ;;  %v2323_v61 = vsub.f32 %v3187_v11, %v1987_v63 }
 0x4c1   : > { %2019 = vst [vmem:[%s4400_s20 + $0xd8] sm:$0xff] %v1987_v63 }
 0x4c2   : > { %v2354_v36 = vmul.f32 %v2322_v50, %v2322_v50  ;;  %v2355_v44 = vmul.f32 %v2323_v61, %v2323_v61 }
 0x4c4   : > { %v1906_v35 = vpop.f32.mrf.mxu2  ;;  %v1955_v46 = vpop.f32.mrf.mxu3  ;;  %v2399_v5 = vadd.f32 %v2355_v44, %v2354_v36 }
 0x4c5   : > { %v1907_v16 = vadd.f32 %v1906_v35, %v4393_v47  ;;  %v1956_v7 = vadd.f32 %v1955_v46, %v4395_v4 }
 0x4c6   : > { %2400 = vadd.xlane.f32.xlu1 %v2399_v5 }
 0x4c7   : > { %v1988_v27 = vmax.f32 %v1907_v16, 0.0  ;;  %v1989_v49 = vmax.f32 %v1956_v7, 0.0 }
 0x4c9   : > { %2020 = vst [vmem:[%s4400_s20 + $0xe0] sm:$0xff] %v1988_v27  ;;  %v2324_v21 = vsub.f32 %v3188_v52, %v1988_v27  ;;  %v2325_v19 = vsub.f32 %v3189_v62, %v1989_v49 }
 0x4ca   : > { %2021 = vst [vmem:[%s4400_s20 + $0xe8] sm:$0xff] %v1989_v49 }
 0x4cb   : > { %v2356_v29 = vmul.f32 %v2324_v21, %v2324_v21  ;;  %v2357_v37 = vmul.f32 %v2325_v19, %v2325_v19 }
 0x4cc   : > { %v1908_v54 = vpop.f32.mrf.mxu2  ;;  %v1957_v33 = vpop.f32.mrf.mxu3 }
 0x4cd   : > { %v1909_v51 = vadd.f32 %v1908_v54, %v4393_v47  ;;  %v1958_v13 = vadd.f32 %v1957_v33, %v4395_v4  ;;  %v2402_v28 = vadd.f32 %v2357_v37, %v2356_v29  ;;  %v4534_v47 = vpop.xlane.xlu1 %2291  ;;  %v3190_v4 = vld [vmem:[%s3657_s14 + $0xf0] sm:$0xff] }
 0x4cf   : > { %v1990_v23 = vmax.f32 %v1909_v51, 0.0  ;;  %v1991_v48 = vmax.f32 %v1958_v13, 0.0  ;;  %2403 = vadd.xlane.f32.xlu2 %v2402_v28 }
 0x4d1   : > { %2022 = vst [vmem:[%s4400_s20 + $0xf0] sm:$0xff] %v1990_v23  ;;  %v2326_v8 = vsub.f32 %v3190_v4, %v1990_v23  ;;  %v2327_v45 = vsub.f32 %v3191_v12, %v1991_v48  ;;  %v2362_v60 = vpop.xlane.xlu0 %2361 }
 0x4d2   : > { %2023 = vst [vmem:[%s4400_s20 + $0xf8] sm:$0xff] %v1991_v48  ;;  %v2411_v1 = vsel %vm2410_vm2, %v2362_v60, 0.0 }
 0x4d3   : > { %v2444_v3 = vadd.f32 %v2428_v55, %v2411_v1  ;;  %v2358_v53 = vmul.f32 %v2326_v8, %v2326_v8  ;;  %v2359_v22 = vmul.f32 %v2327_v45, %v2327_v45 }
 0x4d4   : > { %3339 = shalt.err (!%p3336_p12)
}
 0x4d5   : > { %s3431_s20 = smov 256   ;;  %s3432_s12 = smov 16   ;;  %v2405_v24 = vadd.f32 %v2359_v22, %v2358_v53  ;;  %v4564_v34 = vpop.xlane.xlu2 %2294  ;;  %v2429_v56 = vsel %vm2427_vm1, %v4470_v14, 0.0  ;;  %v2430_v20 = vsel %vm2427_vm1, %v4464_v25, 0.0  ;;  %v2431_v14 = vsel %vm2427_vm1, %v4476_v32, 0.0 }
 0x4d6   : > { %3049 = dma.vmem_to_hbm [thread:$0]  (%p3594_p3), %s4530_s29, 4096, %s4532_s24, %s2477_s18, %s3431_s20, %s3431_s20, %s3432_s12   ;;  %v2432_v25 = vsel %vm2427_vm1, %v4472_v2, 0.0  ;;  %v2433_v32 = vsel %vm2427_vm1, %v4482_v18, 0.0  ;;  %v2434_v2 = vsel %vm2427_vm1, %v4492_v6, 0.0  ;;  %v2435_v18 = vsel %vm2427_vm1, %v4486_v9, 0.0 }
 0x4d7   : > { %s4561_s16 = scalar_lea.vmem [#allocation13], %s2694_s26  ;;  %2406 = vadd.xlane.f32.xlu0 %v2405_v24  ;;  %v2436_v6 = vsel %vm2427_vm1, %v4496_v31, 0.0  ;;  %v2437_v9 = vsel %vm2427_vm1, %v4504_v15, 0.0  ;;  %v2438_v31 = vsel %vm2427_vm1, %v4498_v42, 0.0  ;;  %v2439_v15 = vsel %vm2427_vm1, %v4508_v17, 0.0  ;;  %s3036_s26 = sshll.u32 %s3549_s30, 7 }
 0x4d8   : > { %2460 = vst [vmem:[%s4561_s16] sm:$0xff] %v2444_v3  ;;  %v2440_v42 = vsel %vm2427_vm1, %v4527_v38, 0.0  ;;  %v2441_v17 = vsel %vm2427_vm1, %v4510_v40, 0.0  ;;  %v2442_v38 = vsel %vm2427_vm1, %v4534_v47, 0.0  ;;  %s4753_s29 = sld [smem:[#allocation36_spill]]  ;;  %s2512_s23 = sshll.u32 %s4561_s16, 4  ;;  %v2443_v3 = vsel %vm2427_vm1, %v4564_v34, 0.0  ;;  %s2513_s23 = int_to_ptr.vmem [resolvable:$true] %s2512_s23 }
 0x4d9   : > { %v2365_v30 = vpop.xlane.xlu1 %2364  ;;  %s2482_s30 = scalar_lea.sflag [#allocation14], %s3650_s11 }
 0x4da   : > { %v2412_v26 = vsel %vm2410_vm2, %v2365_v30, 0.0 }
 0x4db   : > { %v2445_v57 = vadd.f32 %v2429_v56, %v2412_v26 }
 0x4dd   : > { %2461 = vst [vmem:[%s4561_s16 + $0x8] sm:$0xff] %v2445_v57 }
 0x4de   : > { %s4754_s24 = smov %s4753_s29  ;;  %s2511_s18 = scalar_lea.hbm %s4753_s29, %s3036_s26 }
 0x4df   : > { %s2514_s25 = sshll.u32 %s2511_s18, 4  ;;  %s3360_s19 = scalar_lea.hbm %s4754_s24, 256  ;;  %s2515_s25 = int_to_ptr.hbm [resolvable:$true] %s2514_s25 }
 0x4e0   : > { %s3354_s14 = sshra.s32 %s2515_s25, 4  ;;  %s3355_s14 = int_to_ptr.hbm [resolvable:$true] %s3354_s14 }
 0x4e1   : > { %v2368_v58 = vpop.xlane.xlu2 %2367  ;;  %s3356_s1 = scalar_lea.hbm %s3355_s14, 128  ;;  %p3361_p7 = scmp.lt.s32.totalorder %s3355_s14, %s4754_s24 }
 0x4e2   : > { %v2413_v39 = vsel %vm2410_vm2, %v2368_v58, 0.0  ;;  %p3357_p13 = scmp.ne.s32.totalorder %s3355_s14, %s3356_s1  ;;  %p3362_p1 = scmp.lt.s32.totalorder %s3360_s19, %s3356_s1 }
 0x4e3   : > { %v2446_v43 = vadd.f32 %v2430_v20, %v2413_v39 }
 0x4e4   : > { %p3358_p0 = pnand %p3357_p13, %p3594_p3  ;;  %p3363_p4 = por %p3362_p1, %p3361_p7 }
 0x4e5   : > { %2462 = vst [vmem:[%s4561_s16 + $0x10] sm:$0xff] %v2446_v43 }
 0x4e6   : > { %p3359_p5 = pneg %p3358_p0 }
 0x4e8   : > { %p3364_p8 = pnand %p3363_p4, %p3359_p5 }
 0x4e9   : > { %v2371_v10 = vpop.xlane.xlu0 %2370 }
 0x4ea   : > { %v2414_v63 = vsel %vm2410_vm2, %v2371_v10, 0.0 }
 0x4eb   : > { %v2447_v59 = vadd.f32 %v2431_v14, %v2414_v63 }
 0x4ed   : > { %2463 = vst [vmem:[%s4561_s16 + $0x18] sm:$0xff] %v2447_v59 }
 0x4f1   : > { %v2374_v50 = vpop.xlane.xlu1 %2373 }
 0x4f2   : > { %v2415_v11 = vsel %vm2410_vm2, %v2374_v50, 0.0 }
 0x4f3   : > { %v2448_v61 = vadd.f32 %v2432_v25, %v2415_v11 }
 0x4f5   : > { %2464 = vst [vmem:[%s4561_s16 + $0x20] sm:$0xff] %v2448_v61 }
 0x4f9   : > { %v2377_v36 = vpop.xlane.xlu2 %2376 }
 0x4fa   : > { %v2416_v44 = vsel %vm2410_vm2, %v2377_v36, 0.0 }
 0x4fb   : > { %v2449_v35 = vadd.f32 %v2433_v32, %v2416_v44 }
 0x4fd   : > { %2465 = vst [vmem:[%s4561_s16 + $0x28] sm:$0xff] %v2449_v35 }
 0x501   : > { %v2380_v46 = vpop.xlane.xlu0 %2379 }
 0x502   : > { %v2417_v5 = vsel %vm2410_vm2, %v2380_v46, 0.0 }
 0x503   : > { %v2450_v16 = vadd.f32 %v2434_v2, %v2417_v5 }
 0x505   : > { %2466 = vst [vmem:[%s4561_s16 + $0x30] sm:$0xff] %v2450_v16 }
 0x509   : > { %v2383_v7 = vpop.xlane.xlu1 %2382 }
 0x50a   : > { %v2418_v0 = vsel %vm2410_vm2, %v2383_v7, 0.0 }
 0x50b   : > { %v2451_v27 = vadd.f32 %v2435_v18, %v2418_v0 }
 0x50d   : > { %2467 = vst [vmem:[%s4561_s16 + $0x38] sm:$0xff] %v2451_v27 }
 0x511   : > { %v2386_v49 = vpop.xlane.xlu2 %2385 }
 0x512   : > { %v2419_v52 = vsel %vm2410_vm2, %v2386_v49, 0.0 }
 0x513   : > { %v2452_v21 = vadd.f32 %v2436_v6, %v2419_v52 }
 0x515   : > { %2468 = vst [vmem:[%s4561_s16 + $0x40] sm:$0xff] %v2452_v21 }
 0x519   : > { %v2389_v62 = vpop.xlane.xlu0 %2388 }
 0x51a   : > { %v2420_v19 = vsel %vm2410_vm2, %v2389_v62, 0.0 }
 0x51b   : > { %v2453_v29 = vadd.f32 %v2437_v9, %v2420_v19 }
 0x51d   : > { %2469 = vst [vmem:[%s4561_s16 + $0x48] sm:$0xff] %v2453_v29 }
 0x521   : > { %v2392_v37 = vpop.xlane.xlu1 %2391 }
 0x522   : > { %v2421_v54 = vsel %vm2410_vm2, %v2392_v37, 0.0 }
 0x523   : > { %v2454_v33 = vadd.f32 %v2438_v31, %v2421_v54 }
 0x525   : > { %2470 = vst [vmem:[%s4561_s16 + $0x50] sm:$0xff] %v2454_v33 }
 0x529   : > { %v2395_v51 = vpop.xlane.xlu2 %2394 }
 0x52a   : > { %v2422_v13 = vsel %vm2410_vm2, %v2395_v51, 0.0 }
 0x52b   : > { %v2455_v28 = vadd.f32 %v2439_v15, %v2422_v13 }
 0x52d   : > { %2471 = vst [vmem:[%s4561_s16 + $0x58] sm:$0xff] %v2455_v28 }
 0x531   : > { %v2398_v23 = vpop.xlane.xlu0 %2397 }
 0x532   : > { %v2423_v48 = vsel %vm2410_vm2, %v2398_v23, 0.0 }
 0x533   : > { %v2456_v4 = vadd.f32 %v2440_v42, %v2423_v48 }
 0x535   : > { %2472 = vst [vmem:[%s4561_s16 + $0x60] sm:$0xff] %v2456_v4 }
 0x539   : > { %v2401_v8 = vpop.xlane.xlu1 %2400 }
 0x53a   : > { %v2424_v12 = vsel %vm2410_vm2, %v2401_v8, 0.0 }
 0x53b   : > { %v2457_v45 = vadd.f32 %v2441_v17, %v2424_v12 }
 0x53d   : > { %2473 = vst [vmem:[%s4561_s16 + $0x68] sm:$0xff] %v2457_v45 }
 0x542   : > { %v2404_v60 = vpop.xlane.xlu2 %2403 }
 0x543   : > { %v2425_v55 = vsel %vm2410_vm2, %v2404_v60, 0.0 }
 0x544   : > { %v2458_v1 = vadd.f32 %v2442_v38, %v2425_v55 }
 0x546   : > { %2474 = vst [vmem:[%s4561_s16 + $0x70] sm:$0xff] %v2458_v1 }
 0x54a   : > { %v2407_v40 = vpop.xlane.xlu0 %2406 }
 0x54b   : > { %v2426_v47 = vsel %vm2410_vm2, %v2407_v40, 0.0 }
 0x54c   : > { %v2459_v53 = vadd.f32 %v2443_v3, %v2426_v47 }
 0x54e   : > { %2475 = vst [vmem:[%s4561_s16 + $0x78] sm:$0xff] %v2459_v53 }
 0x54f   : > { %3367 = shalt.err (!%p3364_p8)
}
 0x550   : > { %s3433_s11 = smov 128   ;;  %s3434_s16 = smov 8  }
 0x551   : > { %3050 = dma.vmem_to_hbm [thread:$0]  (%p3594_p3), %s2513_s23, 2048, %s2515_s25, %s2482_s30, %s3433_s11, %s3433_s11, %s3434_s16  }
 0x552 PF: > { %s4755_s26 = sld [smem:[#allocation21_spill]]  ;;  %p4757_p2 = scmp.ge.s32.totalorder %s3422_s0, 2 }
 0x554   : > { %p3068_p10 = pnand %p4757_p2, %p3563_p6 }
 0x556   : > { %p3069_p11 = pneg %p3068_p10 }
 0x558   : > { %s2529_s13 = sand.u32 1, %s4755_s26  }
 0x559   : > { %s2530_s29 = scalar_lea.sflag [#allocation6], %s2529_s13 }
 0x55a   : > { %3401 = dma.done.wait (%p3069_p11), %s2530_s29, 4096  }
 0x55b   : > { %3403 = vsyncadd (%p3069_p11), %s2530_s29, 4294963200  ;;  %s2540_s18 = scalar_lea.sflag [#allocation14], %s2529_s13 }
 0x55c   : > { %3405 = dma.done.wait (%p3069_p11), %s2540_s18, 2048  }
 0x55d   : > { %3407 = vsyncadd (%p3069_p11), %s2540_s18, 4294965248  ;;  %s4758_s0 = sld [smem:[#allocation24_spill]]  ;;  %s4761_s27 = smov %s3414_s28 }
 0x55e   : > { %s4759_s14 = sld [smem:[#allocation22_spill]] }
 0x55f   : > { %s4760_s29 = sld [smem:[#allocation26_spill]] }
 0x563   : > { %p39_p3 = scmp.ge.s32.totalorder %s4758_s0, 4  }
 0x564   : > { %s4762_s28 = smov %s4759_s14 }
 0x565   :  { %41 = sbr.rel (!%p39_p3) target bundleno = 28 (0x1c), region = 166 }
 0x56a   :  { %2546 = vsyncpa [#allocation5], 1 }
 0x56b   :  { %2548 = vsyncpa [#allocation5 + $0x1], 1 }
 0x56c   :  { %2549 = vsyncpa [#allocation8], 1 }
 0x56d   :  { %2551 = vsyncpa [#allocation8 + $0x1], 1 }
 0x56e   :  { %2552 = vsyncpa [#allocation11], 1 }
 0x56f   :  { %2553 = vsyncpa [#allocation6], 1 }
 0x570   :  { %2555 = vsyncpa [#allocation6 + $0x1], 1 }
 0x571   :  { %2556 = vsyncpa [#allocation14], 1 }
 0x572   :  { %2558 = vsyncpa [#allocation14 + $0x1], 1 }

</bundles_post_ra>
